<compile_context>
chip_gen: v5e
topology: v5e:2x2
jax: 0.10.0
libtpu: 0.0.40
codegen_flags: <defaults>
</compile_context>

<pallas_src>
import math

import jax
import jax.numpy as jnp
from jax.experimental import pallas as pl
from jax.experimental.pallas import tpu as pltpu

d_k = 32
d_v = 32
d_model = 32
n_head = 4
LN_EPS = 1e-5


def _make_kernel(Bt, S, return_attn):
    BS = Bt * S            # rows fed to the projection matmuls
    BH = n_head * Bt       # (head, batch) fused batch dim for attention

    def kernel(q_ref, k_ref, v_ref, mask_ref,
               wq_ref, bq_ref, wk_ref, bk_ref, wv_ref, bv_ref,
               wo_ref, bo_ref, gamma_ref, beta_ref,
               out_ref, *attn_refs):
        f32 = jnp.float32

        x_q = q_ref[...].reshape(BS, d_model)    # also the residual
        x_k = k_ref[...].reshape(BS, d_model)
        x_v = v_ref[...].reshape(BS, d_model)

        def project(x, w_ref, b_ref):
            # heads-as-batch projection: (H, BS, d_model) @ (H, d_model, dh) -> (H, BS, dh)
            xb = jnp.broadcast_to(x[None], (n_head, BS, d_model))
            y = jax.lax.dot_general(
                xb, w_ref[...],
                dimension_numbers=(((2,), (1,)), ((0,), (0,))),
                preferred_element_type=f32)
            y = y + b_ref[...][:, None, :]
            # (H, Bt*S, dh) -> (H*Bt, S, dh): leading-dim split/merge only (layout friendly)
            return y.reshape(BH, S, y.shape[-1])

        qh = project(x_q, wq_ref, bq_ref)   # 1/sqrt(d_k) already folded into wq/bq
        kh = project(x_k, wk_ref, bk_ref)
        vh = project(x_v, wv_ref, bv_ref)

        # scores for all heads & batch elements in one batched matmul; contracts the
        # last dims of both operands (no materialized K transpose).
        scores = jax.lax.dot_general(
            qh, kh, dimension_numbers=(((2,), (2,)), ((0,), (0,))),
            preferred_element_type=f32)                               # (H*Bt, S, S)

        # mask: loaded as int8, broadcast over heads along the (cheap) leading axis,
        # single vectorized compare feeding the select (no f32 copy of the mask).
        mask_i8 = jnp.broadcast_to(mask_ref[...][None],
                                   (n_head, Bt, S, S)).reshape(BH, S, S)
        scores = jnp.where(mask_i8 != 0, f32(-1e9), scores)

        # softmax along the last axis (f32, exact)
        m = jnp.max(scores, axis=-1, keepdims=True)
        e = jnp.exp(scores - m)
        attn = e / jnp.sum(e, axis=-1, keepdims=True)                 # (H*Bt, S, S)

        if return_attn:
            attn_ref = attn_refs[0]
            for h in range(n_head):                                   # static; stores only
                attn_ref[:, h, :, :] = attn[h * Bt:(h + 1) * Bt].astype(attn_ref.dtype)

        ctx = jax.lax.dot_general(
            attn, vh, dimension_numbers=(((2,), (1,)), ((0,), (0,))),
            preferred_element_type=f32)                               # (H*Bt, S, d_v)

        # output projection: sum per-head contributions (ctx_h @ Wo_h) -- no concatenate,
        # the matmul input stays lane-dense.
        ctx3 = ctx.reshape(n_head, BS, d_v)
        outs = jax.lax.dot_general(
            ctx3, wo_ref[...], dimension_numbers=(((2,), (1,)), ((0,), (0,))),
            preferred_element_type=f32)                               # (H, BS, d_model)
        out = jnp.sum(outs, axis=0) + bo_ref[...] + x_q               # + bias + residual

        # LayerNorm over the feature dim (biased variance, matching nn.LayerNorm)
        mean = jnp.mean(out, axis=-1, keepdims=True)
        var = jnp.mean((out - mean) ** 2, axis=-1, keepdims=True)
        normed = (out - mean) * jax.lax.rsqrt(var + LN_EPS)
        normed = normed * gamma_ref[...] + beta_ref[...]

        out_ref[...] = normed.reshape(Bt, S, d_model).astype(out_ref.dtype)

    return kernel


def multi_head_attention(Q, K, V, attn_mask, params, *, return_attn=True, block_b=None):
    """Q, K, V: [B, S, d_model] float32; attn_mask: [B, S, S] bool (True => masked)."""
    B, S, _ = Q.shape

    if block_b is None:
        # >= 2 parallel grid steps when possible (v7x has 2 TensorCores); otherwise a
        # single big block to amortize per-step overhead.  For very large B/S pass a
        # smaller block_b so per-block intermediates stay comfortably inside VMEM.
        block_b = B // 2 if (B >= 2 and B % 2 == 0) else B
    assert B % block_b == 0, "batch must be divisible by block_b"
    num_blocks = B // block_b

    scale = 1.0 / math.sqrt(d_k)
    # Heads-as-batch weight layout, built on the host; fold the score scale into W_Q/b_Q.
    wq3 = params["wq"].reshape(d_model, n_head, d_k).transpose(1, 0, 2) * scale
    bq3 = params["bq"].reshape(n_head, d_k) * scale
    wk3 = params["wk"].reshape(d_model, n_head, d_k).transpose(1, 0, 2)
    bk3 = params["bk"].reshape(n_head, d_k)
    wv3 = params["wv"].reshape(d_model, n_head, d_v).transpose(1, 0, 2)
    bv3 = params["bv"].reshape(n_head, d_v)
    wo3 = params["wo"].reshape(n_head, d_v, d_model)

    mask_i8 = attn_mask.astype(jnp.int8)   # only O(S^2) input: keep its DMA bytes small

    qkv_spec = pl.BlockSpec((block_b, S, d_model), lambda b: (b, 0, 0))
    mask_spec = pl.BlockSpec((block_b, S, S), lambda b: (b, 0, 0))
    w3_spec = pl.BlockSpec((n_head, d_model, d_k), lambda b: (0, 0, 0))
    b3_spec = pl.BlockSpec((n_head, d_k), lambda b: (0, 0))
    wo3_spec = pl.BlockSpec((n_head, d_v, d_model), lambda b: (0, 0, 0))
    vec_spec = pl.BlockSpec((1, d_model), lambda b: (0, 0))

    if return_attn:
        out_shape = (jax.ShapeDtypeStruct((B, S, d_model), jnp.float32),
                     jax.ShapeDtypeStruct((B, n_head, S, S), jnp.float32))
        out_specs = (pl.BlockSpec((block_b, S, d_model), lambda b: (b, 0, 0)),
                     pl.BlockSpec((block_b, n_head, S, S), lambda b: (b, 0, 0, 0)))
    else:
        out_shape = jax.ShapeDtypeStruct((B, S, d_model), jnp.float32)
        out_specs = pl.BlockSpec((block_b, S, d_model), lambda b: (b, 0, 0))

    kernel = _make_kernel(block_b, S, return_attn)

    result = pl.pallas_call(
        kernel,
        out_shape=out_shape,
        grid_spec=pltpu.PrefetchScalarGridSpec(
            num_scalar_prefetch=0,
            grid=(num_blocks,),
            in_specs=[qkv_spec, qkv_spec, qkv_spec, mask_spec,
                      w3_spec, b3_spec,
                      w3_spec, b3_spec,
                      w3_spec, b3_spec,
                      wo3_spec, vec_spec,
                      vec_spec, vec_spec],
            out_specs=out_specs,
        ),
        compiler_params=pltpu.CompilerParams(
            dimension_semantics=("parallel",)),
    )(Q, K, V, mask_i8,
      wq3, bq3, wk3, bk3, wv3, bv3,
      wo3, params["bo"], params["gamma"], params["beta"])

    return result


def init_params(key):
    """Deterministic parameter init (shapes from the PyTorch __init__).

    Linear weights are stored as [in_features, out_features] (x @ W + b)."""
    ks = jax.random.split(key, 8)

    def lin(kw, kb, fan_in, fan_out):
        bound = 1.0 / math.sqrt(fan_in)
        w = jax.random.uniform(kw, (fan_in, fan_out), jnp.float32, -bound, bound)
        b = jax.random.uniform(kb, (1, fan_out), jnp.float32, -bound, bound)
        return w, b

    wq, bq = lin(ks[0], ks[1], d_model, n_head * d_k)
    wk, bk = lin(ks[2], ks[3], d_model, n_head * d_k)
    wv, bv = lin(ks[4], ks[5], d_model, n_head * d_v)
    wo, bo = lin(ks[6], ks[7], n_head * d_v, d_model)
    gamma = jnp.ones((1, d_model), jnp.float32)   # LayerNorm default init
    beta = jnp.zeros((1, d_model), jnp.float32)
    return dict(wq=wq, bq=bq, wk=wk, bk=bk, wv=wv, bv=bv,
                wo=wo, bo=bo, gamma=gamma, beta=beta)


def reference_forward(Q, K, V, attn_mask, p):
    """Pure-JAX reference of the PyTorch module, for a sanity check."""
    B, S, _ = Q.shape

    def proj(x, w, b):
        return (x @ w + b).reshape(B, S, n_head, d_k).transpose(0, 2, 1, 3)

    q_s, k_s, v_s = proj(Q, p["wq"], p["bq"]), proj(K, p["wk"], p["bk"]), proj(V, p["wv"], p["bv"])
    scores = jnp.einsum("bhqd,bhkd->bhqk", q_s, k_s) / math.sqrt(d_k)
    scores = jnp.where(attn_mask[:, None, :, :], -1e9, scores)
    attn = jax.nn.softmax(scores, axis=-1)
    ctx = jnp.einsum("bhqk,bhkd->bhqd", attn, v_s).transpose(0, 2, 1, 3).reshape(B, S, n_head * d_v)
    out = ctx @ p["wo"] + p["bo"] + Q
    mean = out.mean(-1, keepdims=True)
    var = ((out - mean) ** 2).mean(-1, keepdims=True)
    out = (out - mean) / jnp.sqrt(var + LN_EPS) * p["gamma"] + p["beta"]
    return out, attn


if __name__ == "__main__":
    key = jax.random.PRNGKey(0)
    kp, kq, kk, kv, km = jax.random.split(key, 5)

    B, S = 2, 8
    params = init_params(kp)
    Q = jax.random.normal(kq, (B, S, d_model), jnp.float32)
    K = jax.random.normal(kk, (B, S, d_model), jnp.float32)
    V = jax.random.normal(kv, (B, S, d_model), jnp.float32)
    # random boolean mask (True => masked)
    attn_mask = jax.random.bernoulli(km, 0.3, (B, S, S))

    out, attn = multi_head_attention(Q, K, V, attn_mask, params, return_attn=True)
    jax.block_until_ready((out, attn))

    # attention-map writeback is optional (drops the dominant O(n_head*S^2) store stream)
    out_only = multi_head_attention(Q, K, V, attn_mask, params, return_attn=False)
    jax.block_until_ready(out_only)

    ref_out, ref_attn = reference_forward(Q, K, V, attn_mask, params)
    assert jnp.allclose(out, ref_out, atol=1e-4, rtol=1e-4)
    assert jnp.allclose(attn, ref_attn, atol=1e-4, rtol=1e-4)
    assert jnp.allclose(out_only, ref_out, atol=1e-4, rtol=1e-4)

    print("KERNEL_OK")
</pallas_src>

<mosaic_0001>
module attributes {stable_mosaic.version = 11 : i64} {
  func.func @kernel(%arg0: i32, %arg1: memref<1x8x32xf32, #tpu.memory_space<vmem>>, %arg2: memref<1x8x32xf32, #tpu.memory_space<vmem>>, %arg3: memref<1x8x32xf32, #tpu.memory_space<vmem>>, %arg4: memref<1x8x8xi8, #tpu.memory_space<vmem>>, %arg5: memref<4x32x32xf32, #tpu.memory_space<vmem>>, %arg6: memref<4x32xf32, #tpu.memory_space<vmem>>, %arg7: memref<4x32x32xf32, #tpu.memory_space<vmem>>, %arg8: memref<4x32xf32, #tpu.memory_space<vmem>>, %arg9: memref<4x32x32xf32, #tpu.memory_space<vmem>>, %arg10: memref<4x32xf32, #tpu.memory_space<vmem>>, %arg11: memref<4x32x32xf32, #tpu.memory_space<vmem>>, %arg12: memref<1x32xf32, #tpu.memory_space<vmem>>, %arg13: memref<1x32xf32, #tpu.memory_space<vmem>>, %arg14: memref<1x32xf32, #tpu.memory_space<vmem>>, %arg15: memref<1x8x32xf32, #tpu.memory_space<vmem>>, %arg16: memref<1x4x8x8xf32, #tpu.memory_space<vmem>>) attributes {dimension_semantics = [#tpu.dimension_semantics<parallel>], iteration_bounds = array<i64: 2>, scalar_prefetch = 0 : i64, scratch_operands = 0 : i64, tpu.core_type = #tpu.core_type<tc>, window_params = [{transform_indices = @transform_0, window_bounds = array<i64: 1, 8, 32>}, {transform_indices = @transform_1, window_bounds = array<i64: 1, 8, 32>}, {transform_indices = @transform_2, window_bounds = array<i64: 1, 8, 32>}, {transform_indices = @transform_3, window_bounds = array<i64: 1, 8, 8>}, {pipeline_mode = #tpu.pipeline_mode<synchronous>, transform_indices = @transform_4, window_bounds = array<i64: 4, 32, 32>}, {pipeline_mode = #tpu.pipeline_mode<synchronous>, transform_indices = @transform_5, window_bounds = array<i64: 4, 32>}, {pipeline_mode = #tpu.pipeline_mode<synchronous>, transform_indices = @transform_6, window_bounds = array<i64: 4, 32, 32>}, {pipeline_mode = #tpu.pipeline_mode<synchronous>, transform_indices = @transform_7, window_bounds = array<i64: 4, 32>}, {pipeline_mode = #tpu.pipeline_mode<synchronous>, transform_indices = @transform_8, window_bounds = array<i64: 4, 32, 32>}, {pipeline_mode = #tpu.pipeline_mode<synchronous>, transform_indices = @transform_9, window_bounds = array<i64: 4, 32>}, {pipeline_mode = #tpu.pipeline_mode<synchronous>, transform_indices = @transform_10, window_bounds = array<i64: 4, 32, 32>}, {pipeline_mode = #tpu.pipeline_mode<synchronous>, transform_indices = @transform_11, window_bounds = array<i64: 1, 32>}, {pipeline_mode = #tpu.pipeline_mode<synchronous>, transform_indices = @transform_12, window_bounds = array<i64: 1, 32>}, {pipeline_mode = #tpu.pipeline_mode<synchronous>, transform_indices = @transform_13, window_bounds = array<i64: 1, 32>}, {transform_indices = @transform_14, window_bounds = array<i64: 1, 8, 32>}, {transform_indices = @transform_15, window_bounds = array<i64: 1, 4, 8, 8>}]} {
    %c0 = arith.constant 0 : index
    %c0_0 = arith.constant 0 : index
    %c0_1 = arith.constant 0 : index
    %0 = vector.load %arg1[%c0, %c0_0, %c0_1] : memref<1x8x32xf32, #tpu.memory_space<vmem>>, vector<1x8x32xf32>
    %1 = vector.shape_cast %0 : vector<1x8x32xf32> to vector<8x32xf32>
    %c0_2 = arith.constant 0 : index
    %c0_3 = arith.constant 0 : index
    %c0_4 = arith.constant 0 : index
    %2 = vector.load %arg2[%c0_2, %c0_3, %c0_4] : memref<1x8x32xf32, #tpu.memory_space<vmem>>, vector<1x8x32xf32>
    %3 = vector.shape_cast %2 : vector<1x8x32xf32> to vector<8x32xf32>
    %c0_5 = arith.constant 0 : index
    %c0_6 = arith.constant 0 : index
    %c0_7 = arith.constant 0 : index
    %4 = vector.load %arg3[%c0_5, %c0_6, %c0_7] : memref<1x8x32xf32, #tpu.memory_space<vmem>>, vector<1x8x32xf32>
    %5 = vector.shape_cast %4 : vector<1x8x32xf32> to vector<8x32xf32>
    %6 = vector.shape_cast %1 : vector<8x32xf32> to vector<1x8x32xf32>
    %7 = vector.shape_cast %6 : vector<1x8x32xf32> to vector<1x8x32xf32>
    %8 = vector.broadcast %7 : vector<1x8x32xf32> to vector<4x8x32xf32>
    %c0_8 = arith.constant 0 : index
    %c0_9 = arith.constant 0 : index
    %c0_10 = arith.constant 0 : index
    %9 = vector.load %arg5[%c0_8, %c0_9, %c0_10] : memref<4x32x32xf32, #tpu.memory_space<vmem>>, vector<4x32x32xf32>
    %cst = arith.constant dense<0.000000e+00> : vector<4x8x32xf32>
    %10 = tpu.matmul %8, %9, %cst {dimension_numbers = #tpu.dot_dimension_numbers<[2], [1], [1], [2], [0, 0, 0, 1, 1, 2], [0], [0]>} : vector<4x8x32xf32>, vector<4x32x32xf32>, vector<4x8x32xf32> -> vector<4x8x32xf32>
    %c0_11 = arith.constant 0 : index
    %c0_12 = arith.constant 0 : index
    %11 = vector.load %arg6[%c0_11, %c0_12] : memref<4x32xf32, #tpu.memory_space<vmem>>, vector<4x32xf32>
    %12 = vector.shape_cast %11 : vector<4x32xf32> to vector<4x1x32xf32>
    %13 = vector.broadcast %12 : vector<4x1x32xf32> to vector<4x8x32xf32>
    %14 = arith.addf %10, %13 : vector<4x8x32xf32>
    %15 = vector.shape_cast %3 : vector<8x32xf32> to vector<1x8x32xf32>
    %16 = vector.shape_cast %15 : vector<1x8x32xf32> to vector<1x8x32xf32>
    %17 = vector.broadcast %16 : vector<1x8x32xf32> to vector<4x8x32xf32>
    %c0_13 = arith.constant 0 : index
    %c0_14 = arith.constant 0 : index
    %c0_15 = arith.constant 0 : index
    %18 = vector.load %arg7[%c0_13, %c0_14, %c0_15] : memref<4x32x32xf32, #tpu.memory_space<vmem>>, vector<4x32x32xf32>
    %cst_16 = arith.constant dense<0.000000e+00> : vector<4x8x32xf32>
    %19 = tpu.matmul %17, %18, %cst_16 {dimension_numbers = #tpu.dot_dimension_numbers<[2], [1], [1], [2], [0, 0, 0, 1, 1, 2], [0], [0]>} : vector<4x8x32xf32>, vector<4x32x32xf32>, vector<4x8x32xf32> -> vector<4x8x32xf32>
    %c0_17 = arith.constant 0 : index
    %c0_18 = arith.constant 0 : index
    %20 = vector.load %arg8[%c0_17, %c0_18] : memref<4x32xf32, #tpu.memory_space<vmem>>, vector<4x32xf32>
    %21 = vector.shape_cast %20 : vector<4x32xf32> to vector<4x1x32xf32>
    %22 = vector.broadcast %21 : vector<4x1x32xf32> to vector<4x8x32xf32>
    %23 = arith.addf %19, %22 : vector<4x8x32xf32>
    %24 = vector.shape_cast %5 : vector<8x32xf32> to vector<1x8x32xf32>
    %25 = vector.shape_cast %24 : vector<1x8x32xf32> to vector<1x8x32xf32>
    %26 = vector.broadcast %25 : vector<1x8x32xf32> to vector<4x8x32xf32>
    %c0_19 = arith.constant 0 : index
    %c0_20 = arith.constant 0 : index
    %c0_21 = arith.constant 0 : index
    %27 = vector.load %arg9[%c0_19, %c0_20, %c0_21] : memref<4x32x32xf32, #tpu.memory_space<vmem>>, vector<4x32x32xf32>
    %cst_22 = arith.constant dense<0.000000e+00> : vector<4x8x32xf32>
    %28 = tpu.matmul %26, %27, %cst_22 {dimension_numbers = #tpu.dot_dimension_numbers<[2], [1], [1], [2], [0, 0, 0, 1, 1, 2], [0], [0]>} : vector<4x8x32xf32>, vector<4x32x32xf32>, vector<4x8x32xf32> -> vector<4x8x32xf32>
    %c0_23 = arith.constant 0 : index
    %c0_24 = arith.constant 0 : index
    %29 = vector.load %arg10[%c0_23, %c0_24] : memref<4x32xf32, #tpu.memory_space<vmem>>, vector<4x32xf32>
    %30 = vector.shape_cast %29 : vector<4x32xf32> to vector<4x1x32xf32>
    %31 = vector.broadcast %30 : vector<4x1x32xf32> to vector<4x8x32xf32>
    %32 = arith.addf %28, %31 : vector<4x8x32xf32>
    %cst_25 = arith.constant dense<0.000000e+00> : vector<4x8x8xf32>
    %33 = tpu.matmul %14, %23, %cst_25 {dimension_numbers = #tpu.dot_dimension_numbers<[2], [2], [1], [1], [0, 0, 0, 1, 1, 1], [0], [0]>} : vector<4x8x32xf32>, vector<4x8x32xf32>, vector<4x8x8xf32> -> vector<4x8x8xf32>
    %c0_26 = arith.constant 0 : index
    %c0_27 = arith.constant 0 : index
    %c0_28 = arith.constant 0 : index
    %34 = vector.load %arg4[%c0_26, %c0_27, %c0_28] : memref<1x8x8xi8, #tpu.memory_space<vmem>>, vector<1x8x8xi8>
    %35 = vector.shape_cast %34 : vector<1x8x8xi8> to vector<1x1x8x8xi8>
    %36 = vector.shape_cast %35 : vector<1x1x8x8xi8> to vector<1x1x8x8xi8>
    %37 = vector.broadcast %36 : vector<1x1x8x8xi8> to vector<4x1x8x8xi8>
    %38 = vector.shape_cast %37 : vector<4x1x8x8xi8> to vector<4x8x8xi8>
    %c0_i8 = arith.constant 0 : i8
    %39 = vector.broadcast %c0_i8 : i8 to vector<4x8x8xi8>
    %40 = arith.cmpi ne, %38, %39 : vector<4x8x8xi8>
    %cst_29 = arith.constant -1.000000e+09 : f32
    %41 = vector.broadcast %cst_29 : f32 to vector<4x8x8xf32>
    %42 = arith.select %40, %41, %33 : vector<4x8x8xi1>, vector<4x8x8xf32>
    %cst_30 = arith.constant dense<0xFF800000> : vector<4x8xf32>
    %43 = vector.multi_reduction <maximumf>, %42, %cst_30 [2] : vector<4x8x8xf32> to vector<4x8xf32>
    %44 = vector.shape_cast %43 : vector<4x8xf32> to vector<4x8x1xf32>
    %45 = vector.broadcast %44 : vector<4x8x1xf32> to vector<4x8x8xf32>
    %46 = arith.subf %42, %45 : vector<4x8x8xf32>
    %47 = math.exp %46 : vector<4x8x8xf32>
    %cst_31 = arith.constant dense<0.000000e+00> : vector<4x8xf32>
    %48 = vector.multi_reduction <add>, %47, %cst_31 [2] : vector<4x8x8xf32> to vector<4x8xf32>
    %49 = vector.shape_cast %48 : vector<4x8xf32> to vector<4x8x1xf32>
    %50 = vector.broadcast %49 : vector<4x8x1xf32> to vector<4x8x8xf32>
    %51 = arith.divf %47, %50 : vector<4x8x8xf32>
    %52 = vector.extract_strided_slice %51 {offsets = [0, 0, 0], sizes = [1, 8, 8], strides = [1, 1, 1]} : vector<4x8x8xf32> to vector<1x8x8xf32>
    %c0_32 = arith.constant 0 : index
    %c0_33 = arith.constant 0 : index
    %c0_34 = arith.constant 0 : index
    %c0_35 = arith.constant 0 : index
    %53 = vector.load %arg16[%c0_32, %c0_33, %c0_34, %c0_35] : memref<1x4x8x8xf32, #tpu.memory_space<vmem>>, vector<1x1x8x8xf32>
    %54 = vector.shape_cast %53 : vector<1x1x8x8xf32> to vector<1x8x8xf32>
    %55 = vector.shape_cast %52 : vector<1x8x8xf32> to vector<1x1x8x8xf32>
    tpu.vector_store %arg16[%c0_32, %c0_33, %c0_34, %c0_35], %55 {strides = array<i32>} : memref<1x4x8x8xf32, #tpu.memory_space<vmem>>, vector<1x1x8x8xf32>,
    %56 = vector.extract_strided_slice %51 {offsets = [1, 0, 0], sizes = [1, 8, 8], strides = [1, 1, 1]} : vector<4x8x8xf32> to vector<1x8x8xf32>
    %c0_36 = arith.constant 0 : index
    %c1 = arith.constant 1 : index
    %c0_37 = arith.constant 0 : index
    %c0_38 = arith.constant 0 : index
    %57 = vector.load %arg16[%c0_36, %c1, %c0_37, %c0_38] : memref<1x4x8x8xf32, #tpu.memory_space<vmem>>, vector<1x1x8x8xf32>
    %58 = vector.shape_cast %57 : vector<1x1x8x8xf32> to vector<1x8x8xf32>
    %59 = vector.shape_cast %56 : vector<1x8x8xf32> to vector<1x1x8x8xf32>
    tpu.vector_store %arg16[%c0_36, %c1, %c0_37, %c0_38], %59 {strides = array<i32>} : memref<1x4x8x8xf32, #tpu.memory_space<vmem>>, vector<1x1x8x8xf32>,
    %60 = vector.extract_strided_slice %51 {offsets = [2, 0, 0], sizes = [1, 8, 8], strides = [1, 1, 1]} : vector<4x8x8xf32> to vector<1x8x8xf32>
    %c0_39 = arith.constant 0 : index
    %c2 = arith.constant 2 : index
    %c0_40 = arith.constant 0 : index
    %c0_41 = arith.constant 0 : index
    %61 = vector.load %arg16[%c0_39, %c2, %c0_40, %c0_41] : memref<1x4x8x8xf32, #tpu.memory_space<vmem>>, vector<1x1x8x8xf32>
    %62 = vector.shape_cast %61 : vector<1x1x8x8xf32> to vector<1x8x8xf32>
    %63 = vector.shape_cast %60 : vector<1x8x8xf32> to vector<1x1x8x8xf32>
    tpu.vector_store %arg16[%c0_39, %c2, %c0_40, %c0_41], %63 {strides = array<i32>} : memref<1x4x8x8xf32, #tpu.memory_space<vmem>>, vector<1x1x8x8xf32>,
    %64 = vector.extract_strided_slice %51 {offsets = [3, 0, 0], sizes = [1, 8, 8], strides = [1, 1, 1]} : vector<4x8x8xf32> to vector<1x8x8xf32>
    %c0_42 = arith.constant 0 : index
    %c3 = arith.constant 3 : index
    %c0_43 = arith.constant 0 : index
    %c0_44 = arith.constant 0 : index
    %65 = vector.load %arg16[%c0_42, %c3, %c0_43, %c0_44] : memref<1x4x8x8xf32, #tpu.memory_space<vmem>>, vector<1x1x8x8xf32>
    %66 = vector.shape_cast %65 : vector<1x1x8x8xf32> to vector<1x8x8xf32>
    %67 = vector.shape_cast %64 : vector<1x8x8xf32> to vector<1x1x8x8xf32>
    tpu.vector_store %arg16[%c0_42, %c3, %c0_43, %c0_44], %67 {strides = array<i32>} : memref<1x4x8x8xf32, #tpu.memory_space<vmem>>, vector<1x1x8x8xf32>,
    %cst_45 = arith.constant dense<0.000000e+00> : vector<4x8x32xf32>
    %68 = tpu.matmul %51, %32, %cst_45 {dimension_numbers = #tpu.dot_dimension_numbers<[2], [1], [1], [2], [0, 0, 0, 1, 1, 2], [0], [0]>} : vector<4x8x8xf32>, vector<4x8x32xf32>, vector<4x8x32xf32> -> vector<4x8x32xf32>
    %c0_46 = arith.constant 0 : index
    %c0_47 = arith.constant 0 : index
    %c0_48 = arith.constant 0 : index
    %69 = vector.load %arg11[%c0_46, %c0_47, %c0_48] : memref<4x32x32xf32, #tpu.memory_space<vmem>>, vector<4x32x32xf32>
    %cst_49 = arith.constant dense<0.000000e+00> : vector<4x8x32xf32>
    %70 = tpu.matmul %68, %69, %cst_49 {dimension_numbers = #tpu.dot_dimension_numbers<[2], [1], [1], [2], [0, 0, 0, 1, 1, 2], [0], [0]>} : vector<4x8x32xf32>, vector<4x32x32xf32>, vector<4x8x32xf32> -> vector<4x8x32xf32>
    %cst_50 = arith.constant dense<0.000000e+00> : vector<8x32xf32>
    %71 = vector.multi_reduction <add>, %70, %cst_50 [0] : vector<4x8x32xf32> to vector<8x32xf32>
    %c0_51 = arith.constant 0 : index
    %c0_52 = arith.constant 0 : index
    %72 = vector.load %arg12[%c0_51, %c0_52] : memref<1x32xf32, #tpu.memory_space<vmem>>, vector<1x32xf32>
    %73 = vector.broadcast %72 : vector<1x32xf32> to vector<8x32xf32>
    %74 = arith.addf %71, %73 : vector<8x32xf32>
    %75 = arith.addf %74, %1 : vector<8x32xf32>
    %cst_53 = arith.constant dense<0.000000e+00> : vector<8xf32>
    %76 = vector.multi_reduction <add>, %75, %cst_53 [1] : vector<8x32xf32> to vector<8xf32>
    %77 = vector.shape_cast %76 : vector<8xf32> to vector<8x1xf32>
    %cst_54 = arith.constant 3.200000e+01 : f32
    %78 = vector.broadcast %cst_54 : f32 to vector<8x1xf32>
    %79 = arith.divf %77, %78 : vector<8x1xf32>
    %80 = vector.broadcast %79 : vector<8x1xf32> to vector<8x32xf32>
    %81 = arith.subf %75, %80 : vector<8x32xf32>
    %82 = arith.mulf %81, %81 : vector<8x32xf32>
    %cst_55 = arith.constant dense<0.000000e+00> : vector<8xf32>
    %83 = vector.multi_reduction <add>, %82, %cst_55 [1] : vector<8x32xf32> to vector<8xf32>
    %84 = vector.shape_cast %83 : vector<8xf32> to vector<8x1xf32>
    %cst_56 = arith.constant 3.200000e+01 : f32
    %85 = vector.broadcast %cst_56 : f32 to vector<8x1xf32>
    %86 = arith.divf %84, %85 : vector<8x1xf32>
    %87 = vector.broadcast %79 : vector<8x1xf32> to vector<8x32xf32>
    %88 = arith.subf %75, %87 : vector<8x32xf32>
    %cst_57 = arith.constant 9.99999974E-6 : f32
    %89 = vector.broadcast %cst_57 : f32 to vector<8x1xf32>
    %90 = arith.addf %86, %89 : vector<8x1xf32>
    %91 = math.rsqrt %90 : vector<8x1xf32>
    %92 = vector.broadcast %91 : vector<8x1xf32> to vector<8x32xf32>
    %93 = arith.mulf %88, %92 : vector<8x32xf32>
    %c0_58 = arith.constant 0 : index
    %c0_59 = arith.constant 0 : index
    %94 = vector.load %arg13[%c0_58, %c0_59] : memref<1x32xf32, #tpu.memory_space<vmem>>, vector<1x32xf32>
    %95 = vector.broadcast %94 : vector<1x32xf32> to vector<8x32xf32>
    %96 = arith.mulf %93, %95 : vector<8x32xf32>
    %c0_60 = arith.constant 0 : index
    %c0_61 = arith.constant 0 : index
    %97 = vector.load %arg14[%c0_60, %c0_61] : memref<1x32xf32, #tpu.memory_space<vmem>>, vector<1x32xf32>
    %98 = vector.broadcast %97 : vector<1x32xf32> to vector<8x32xf32>
    %99 = arith.addf %96, %98 : vector<8x32xf32>
    %100 = vector.shape_cast %99 : vector<8x32xf32> to vector<1x8x32xf32>
    %c0_62 = arith.constant 0 : index
    %c0_63 = arith.constant 0 : index
    %c0_64 = arith.constant 0 : index
    %101 = vector.load %arg15[%c0_62, %c0_63, %c0_64] : memref<1x8x32xf32, #tpu.memory_space<vmem>>, vector<1x8x32xf32>
    tpu.vector_store %arg15[%c0_62, %c0_63, %c0_64], %100 {strides = array<i32>} : memref<1x8x32xf32, #tpu.memory_space<vmem>>, vector<1x8x32xf32>,
    return
  }
  func.func @transform_0(%arg0: i32) -> (i32, i32, i32) {
    %c0_i32 = arith.constant 0 : i32
    %c0_i32_0 = arith.constant 0 : i32
    %c0_i32_1 = arith.constant 0 : i32
    return %arg0, %c0_i32, %c0_i32_0 : i32, i32, i32
  }
  func.func @transform_1(%arg0: i32) -> (i32, i32, i32) {
    %c0_i32 = arith.constant 0 : i32
    %c0_i32_0 = arith.constant 0 : i32
    %c0_i32_1 = arith.constant 0 : i32
    return %arg0, %c0_i32, %c0_i32_0 : i32, i32, i32
  }
  func.func @transform_2(%arg0: i32) -> (i32, i32, i32) {
    %c0_i32 = arith.constant 0 : i32
    %c0_i32_0 = arith.constant 0 : i32
    %c0_i32_1 = arith.constant 0 : i32
    return %arg0, %c0_i32, %c0_i32_0 : i32, i32, i32
  }
  func.func @transform_3(%arg0: i32) -> (i32, i32, i32) {
    %c0_i32 = arith.constant 0 : i32
    %c0_i32_0 = arith.constant 0 : i32
    %c0_i32_1 = arith.constant 0 : i32
    return %arg0, %c0_i32, %c0_i32_0 : i32, i32, i32
  }
  func.func @transform_4(%arg0: i32) -> (i32, i32, i32) {
    %c0_i32 = arith.constant 0 : i32
    %c0_i32_0 = arith.constant 0 : i32
    %c0_i32_1 = arith.constant 0 : i32
    %c0_i32_2 = arith.constant 0 : i32
    return %c0_i32, %c0_i32_0, %c0_i32_1 : i32, i32, i32
  }
  func.func @transform_5(%arg0: i32) -> (i32, i32) {
    %c0_i32 = arith.constant 0 : i32
    %c0_i32_0 = arith.constant 0 : i32
    %c0_i32_1 = arith.constant 0 : i32
    return %c0_i32, %c0_i32_0 : i32, i32
  }
  func.func @transform_6(%arg0: i32) -> (i32, i32, i32) {
    %c0_i32 = arith.constant 0 : i32
    %c0_i32_0 = arith.constant 0 : i32
    %c0_i32_1 = arith.constant 0 : i32
    %c0_i32_2 = arith.constant 0 : i32
    return %c0_i32, %c0_i32_0, %c0_i32_1 : i32, i32, i32
  }
  func.func @transform_7(%arg0: i32) -> (i32, i32) {
    %c0_i32 = arith.constant 0 : i32
    %c0_i32_0 = arith.constant 0 : i32
    %c0_i32_1 = arith.constant 0 : i32
    return %c0_i32, %c0_i32_0 : i32, i32
  }
  func.func @transform_8(%arg0: i32) -> (i32, i32, i32) {
    %c0_i32 = arith.constant 0 : i32
    %c0_i32_0 = arith.constant 0 : i32
    %c0_i32_1 = arith.constant 0 : i32
    %c0_i32_2 = arith.constant 0 : i32
    return %c0_i32, %c0_i32_0, %c0_i32_1 : i32, i32, i32
  }
  func.func @transform_9(%arg0: i32) -> (i32, i32) {
    %c0_i32 = arith.constant 0 : i32
    %c0_i32_0 = arith.constant 0 : i32
    %c0_i32_1 = arith.constant 0 : i32
    return %c0_i32, %c0_i32_0 : i32, i32
  }
  func.func @transform_10(%arg0: i32) -> (i32, i32, i32) {
    %c0_i32 = arith.constant 0 : i32
    %c0_i32_0 = arith.constant 0 : i32
    %c0_i32_1 = arith.constant 0 : i32
    %c0_i32_2 = arith.constant 0 : i32
    return %c0_i32, %c0_i32_0, %c0_i32_1 : i32, i32, i32
  }
  func.func @transform_11(%arg0: i32) -> (i32, i32) {
    %c0_i32 = arith.constant 0 : i32
    %c0_i32_0 = arith.constant 0 : i32
    %c0_i32_1 = arith.constant 0 : i32
    return %c0_i32, %c0_i32_0 : i32, i32
  }
  func.func @transform_12(%arg0: i32) -> (i32, i32) {
    %c0_i32 = arith.constant 0 : i32
    %c0_i32_0 = arith.constant 0 : i32
    %c0_i32_1 = arith.constant 0 : i32
    return %c0_i32, %c0_i32_0 : i32, i32
  }
  func.func @transform_13(%arg0: i32) -> (i32, i32) {
    %c0_i32 = arith.constant 0 : i32
    %c0_i32_0 = arith.constant 0 : i32
    %c0_i32_1 = arith.constant 0 : i32
    return %c0_i32, %c0_i32_0 : i32, i32
  }
  func.func @transform_14(%arg0: i32) -> (i32, i32, i32) {
    %c0_i32 = arith.constant 0 : i32
    %c0_i32_0 = arith.constant 0 : i32
    %c0_i32_1 = arith.constant 0 : i32
    return %arg0, %c0_i32, %c0_i32_0 : i32, i32, i32
  }
  func.func @transform_15(%arg0: i32) -> (i32, i32, i32, i32) {
    %c0_i32 = arith.constant 0 : i32
    %c0_i32_0 = arith.constant 0 : i32
    %c0_i32_1 = arith.constant 0 : i32
    %c0_i32_2 = arith.constant 0 : i32
    return %arg0, %c0_i32, %c0_i32_0, %c0_i32_1 : i32, i32, i32, i32
  }
}

</mosaic_0001>

<bundles_post_ra>
// kernel: tpu_custom_call.1
= control target key start
LH: loop header
LB: loop body
LE: loop exit
PB: predicated region body
PF: predicated region fallthrough
CT: control target
= control target key end

     0   :  { %s2858_s0 = inlined_call_operand.hbm [shape: f32[2,8,32], index: 0, kind: input, shape index: {}]   ;;  %s2859_s1 = inlined_call_operand.hbm [shape: f32[2,8,32], index: 1, kind: input, shape index: {}]   ;;  %s2860_s2 = inlined_call_operand.hbm [shape: f32[2,8,32], index: 2, kind: input, shape index: {}]   ;;  %s2861_s3 = inlined_call_operand.hbm [shape: s8[2,8,8], index: 3, kind: input, shape index: {}]   ;;  %s2862_s4 = inlined_call_operand.hbm [shape: f32[4,32,32], index: 4, kind: input, shape index: {}]   ;;  %s2863_s5 = inlined_call_operand.vmem [shape: f32[4,32], index: 5, kind: input, shape index: {}]   ;;  %s2864_s6 = inlined_call_operand.hbm [shape: f32[4,32,32], index: 6, kind: input, shape index: {}]   ;;  %s2865_s7 = inlined_call_operand.hbm [shape: f32[4,32], index: 7, kind: input, shape index: {}]   ;;  %s2866_s8 = inlined_call_operand.hbm [shape: f32[4,32,32], index: 8, kind: input, shape index: {}]   ;;  %s2867_s9 = inlined_call_operand.vmem [shape: f32[4,32], index: 9, kind: input, shape index: {}]   ;;  %s2868_s10 = inlined_call_operand.hbm [shape: f32[4,32,32], index: 10, kind: input, shape index: {}]   ;;  %s2869_s11 = inlined_call_operand.vmem [shape: f32[1,32], index: 11, kind: input, shape index: {}]   ;;  %s2870_s12 = inlined_call_operand.vmem [shape: f32[1,32], index: 12, kind: input, shape index: {}]   ;;  %s2871_s13 = inlined_call_operand.vmem [shape: f32[1,32], index: 13, kind: input, shape index: {}]   ;;  %s2872_s14 = inlined_call_operand.hbm [shape: f32[2,8,32], index: 14, kind: output, shape index: {0}]   ;;  %s2873_s15 = inlined_call_operand.hbm [shape: f32[2,4,8,8], index: 15, kind: output, shape index: {1}]  }
   0x1   :  { %2887 = sst [smem:[#allocation34_spill]] %s2859_s1 }
   0x2   :  { %2888 = sst [smem:[#allocation35_spill]] %s2862_s4 }
   0x3   :  { %2889 = sst [smem:[#allocation36_spill]] %s2864_s6 }
   0x4   :  { %2890 = sst [smem:[#allocation37_spill]] %s2865_s7 }
   0x5   :  { %2891 = sst [smem:[#allocation38_spill]] %s2866_s8 }
   0x6   :  { %2892 = sst [smem:[#allocation39_spill]] %s2869_s11 }
   0x7   :  { %2893 = sst [smem:[#allocation40_spill]] %s2870_s12 }
   0x8   :  { %2894 = sst [smem:[#allocation41_spill]] %s2871_s13 }
   0x9   :  { %2895 = sst [smem:[#allocation42_spill]] %s2872_s14 }
   0xa   :  { %2896 = sst [smem:[#allocation43_spill]] %s2873_s15 }
   0xb   :  { %21 = vsyncpa [#allocation3], 0 }
   0xc   :  { %23 = vsyncpa [#allocation3 + $0x1], 0 }
   0xd   :  { %24 = vsyncpa [#allocation6], 0 }
   0xe   :  { %26 = vsyncpa [#allocation6 + $0x1], 0 }
   0xf   :  { %27 = vsyncpa [#allocation9], 0 }
  0x10   :  { %29 = vsyncpa [#allocation9 + $0x1], 0 }
  0x11   :  { %30 = vsyncpa [#allocation12], 0 }
  0x12   :  { %31 = vsyncpa [#allocation15], 0 }
  0x13   :  { %32 = vsyncpa [#allocation4], 0 }
  0x14   :  { %34 = vsyncpa [#allocation4 + $0x1], 0 }
  0x15   :  { %35 = vsyncpa [#allocation19], 0 }
  0x16   :  { %37 = vsyncpa [#allocation19 + $0x1], 0  ;;  %s2477_s18 = smov 0   ;;  %s2479_s19 = smov 0  }
  0x17   :  { %s2481_s20 = smov 0   ;;  %s2483_s21 = smov 0  }
  0x18 LB: > { %2897 = sst [smem:[#allocation28_spill]] %s2372_s18  ;;  %s2501_s25 = sadd.s32 4294967295, %s2384_s21   ;;  %s2384_s21 = sphi %s2483_s21, %s2932_s21   ;;  %s2380_s20 = sphi %s2481_s20, %s2937_s20   ;;  %s2376_s19 = sphi %s2479_s19, %s2936_s19   ;;  %s2372_s18 = sphi %s2477_s18, %s2935_s18  }
  0x19   : > { %2898 = sst [smem:[#allocation29_spill]] %s2380_s20  ;;  %p1784_p0 = scmp.ge.s32.totalorder %s2384_s21, 1 }
  0x1a   : > { %s2899_s4 = sld [smem:[#allocation35_spill]]  ;;  %p2883_p1 = scmp.eq.s32.totalorder %s2501_s25, 0 }
  0x1b   : > { %p414_p2 = scmp.lt.s32.totalorder %s2384_s21, 3  ;;  %s2386_s27 = smov [#allocation10]  }
  0x1c   : > { %s427_s28 = sshll.u32 %s2386_s27, 4  ;;  %s2901_s6 = sld [smem:[#allocation36_spill]]  ;;  %s428_s28 = int_to_ptr.vmem [resolvable:$true] %s427_s28 }
  0x1d   : > { %p2506_p3 = pnand %p1784_p0, %p414_p2  ;;  %s2903_s8 = sld [smem:[#allocation38_spill]] }
  0x1e   : > { %s2874_s30 = smov 128   ;;  %s50_s23 = sadd.s32 1, %s2380_s20 }
  0x1f   : > { %p1882_p4 = pneg %p2506_p3  ;;  %p57_p7 = scmp.ne.s32.totalorder %s2380_s20, %s2376_s19 }
  0x20   : > { %s425_s24 = sshll.u32 %s2899_s4, 4  ;;  %s2387_s4 = smov [#allocation11]   ;;  %s426_s24 = int_to_ptr.hbm [resolvable:$true] %s425_s24 }
  0x21   : > { %p2518_p6 = pnand %p1882_p4, %p2883_p1  ;;  %s444_s29 = sshll.u32 %s2387_s4, 4  ;;  %s445_s29 = int_to_ptr.vmem [resolvable:$true] %s444_s29 }
  0x22   : > { %s442_s16 = sshll.u32 %s2901_s6, 4  ;;  %s2875_s6 = smov 8   ;;  %s443_s16 = int_to_ptr.hbm [resolvable:$true] %s442_s16 }
  0x23   : > { %s468_s27 = sshll.u32 %s2903_s8, 4  ;;  %s2390_s4 = smov [#allocation14]   ;;  %s469_s27 = int_to_ptr.hbm [resolvable:$true] %s468_s27 }
  0x24   : > { %1885 = dma.hbm_to_vmem [thread:$0]  (!%p2518_p6), %s426_s24, 2048, %s428_s28, [#allocation9], %s2874_s30, %s2874_s30, %s2875_s6  }
  0x25   : > { %1888 = dma.hbm_to_vmem [thread:$0]  (!%p2518_p6), %s443_s16, 2048, %s445_s29, [#allocation12], %s2874_s30, %s2874_s30, %s2875_s6  }
  0x26   : > { %s470_s22 = sshll.u32 %s2390_s4, 4  ;;  %s1783_s24 = sadd.s32 4294967294, %s2384_s21   ;;  %s471_s22 = int_to_ptr.vmem [resolvable:$true] %s470_s22 }
  0x27   : > { %1894 = dma.hbm_to_vmem [thread:$0]  (!%p2518_p6), %s469_s27, 2048, %s471_s22, [#allocation15], %s2874_s30, %s2874_s30, %s2875_s6  }
  0x28   : > { %s2542_s28 = sadd.s32 1, %s2384_s21   ;;  %p58_p9 = scmp.eq.s32.totalorder %s2384_s21, 0 }
  0x29   : > { %2904 = sst [smem:[#allocation30_spill]] %s2542_s28  ;;  %s47_s8 = ssub.s32 %s2384_s21, %s2542_s28 }
  0x2a   : > { %p48_p8 = scmp.eq.s32.totalorder %s47_s8, 0  ;;  %p63_p10 = scmp.ne.s32.totalorder %s2376_s19, %s2372_s18 }
  0x2b   : > { %p375_p11 = scmp.eq.s32.totalorder %s2501_s25, 1  ;;  %p59_p12 = por %p58_p9, %p57_p7 }
  0x2c   : > { %s2554_s16 = scalar_select %p48_p8, %s2380_s20, %s50_s23  }
  0x2d   : > { %p2558_p13 = por %p2883_p1, %p63_p10  ;;  %p2562_p0 = por %p375_p11, %p57_p7 }
  0x2e   : > { %2905 = sst [smem:[#allocation31_spill]] %s2554_s16  ;;  %p381_p2 = scmp.eq.s32.totalorder %s1783_s24, 1 }
  0x2f   : > { %s2907_s29 = scalar_select %p2562_p0, 1, 0 }
  0x30   : > { %p1923_p4 = scmp.lt.s32.totalorder %s2384_s21, 2  ;;  %s2568_s4 = sand.u32 1, %s2380_s20  }
  0x31   : > { %2908 = sst [smem:[#allocation32_spill]] %s2907_s29  ;;  %p2570_p5 = por %p381_p2, %p63_p10 }
  0x32   : > { %s2575_s22 = sshll.u32 %s2568_s4, 3  ;;  %s2578_s23 = sshll.u32 %s2384_s21, 3 }
  0x33   : > { %s2909_s8 = scalar_select %p2570_p5, 1, 0 }
  0x34   : > { %p2580_p8 = pnand %p1923_p4, %p59_p12  ;;  %s2884_s24 = sand.u32 1, %s2384_s21  }
  0x35   : > { %2910 = sst [smem:[#allocation33_spill]] %s2909_s8  ;;  %s533_s28 = scalar_lea.vmem [#allocation5], %s2575_s22 }
  0x36   : > { %s2912_s1 = sld [smem:[#allocation34_spill]]  ;;  %s541_s18 = sshll.u32 %s533_s28, 4  ;;  %s542_s18 = int_to_ptr.vmem [resolvable:$true] %s541_s18 }
  0x37   : > { %s2592_s13 = scalar_lea.sflag [#allocation6], %s2884_s24  ;;  %p2090_p9 = pneg %p2580_p8 }
  0x3c   : > { %s537_s20 = scalar_lea.hbm %s2912_s1, %s2578_s23  ;;  %s2093_s28 = scalar_lea.hbm %s2912_s1, 16 }
  0x3d   : > { %s539_s8 = sshll.u32 %s537_s20, 4  ;;  %s540_s8 = int_to_ptr.hbm [resolvable:$true] %s539_s8 }
  0x3e   : > { %s2086_s14 = sshra.s32 %s540_s8, 4  ;;  %s2087_s14 = int_to_ptr.hbm [resolvable:$true] %s2086_s14 }
  0x3f   : > { %s2088_s12 = scalar_lea.hbm %s2087_s14, 8  ;;  %p2094_p12 = scmp.lt.s32.totalorder %s2087_s14, %s2912_s1 }
  0x40   : > { %p2089_p7 = scmp.ne.s32.totalorder %s2087_s14, %s2088_s12  ;;  %p2095_p2 = scmp.lt.s32.totalorder %s2093_s28, %s2088_s12 }
  0x42   : > { %p2091_p10 = pnand %p2090_p9, %p2089_p7  ;;  %p2096_p4 = por %p2095_p2, %p2094_p12 }
  0x44   : > { %p2092_p11 = pneg %p2091_p10 }
  0x46   : > { %p2097_p1 = pnand %p2096_p4, %p2092_p11 }
  0x48   : > { %2100 = shalt.err (!%p2097_p1)
}
  0x49   : > { %1904 = dma.hbm_to_vmem [thread:$0]  (!%p2580_p8), %s540_s8, 128, %s542_s18, %s2592_s13  }
  0x4a   : > { %s2913_s7 = sld [smem:[#allocation37_spill]]  ;;  %s2391_s16 = smov [#allocation13]  }
  0x4b   : > { %s459_s14 = sshll.u32 %s2391_s16, 4  ;;  %s485_s28 = sshll.u32 %s2868_s10, 4  ;;  %s460_s14 = int_to_ptr.vmem [resolvable:$true] %s459_s14  ;;  %s486_s28 = int_to_ptr.hbm [resolvable:$true] %s485_s28 }
  0x4c   : > { %s2392_s20 = smov [#allocation16]   ;;  %s2914_s18 = smov 8  }
  0x4d   : > { %s487_s1 = sshll.u32 %s2392_s20, 4  ;;  %s2915_s29 = smov 128   ;;  %s488_s1 = int_to_ptr.vmem [resolvable:$true] %s487_s1 }
  0x4e   : > { %1897 = dma.hbm_to_vmem [thread:$0]  (!%p2518_p6), %s486_s28, 2048, %s488_s1, [#allocation15], %s2915_s29, %s2915_s29, %s2914_s18  }
  0x4f   : > { %s518_s16 = scalar_lea.hbm %s2858_s0, %s2578_s23  ;;  %s2183_s28 = scalar_lea.hbm %s2858_s0, 16 }
  0x50   : > { %s457_s6 = sshll.u32 %s2913_s7, 4  ;;  %s514_s7 = scalar_lea.vmem [#allocation2], %s2575_s22  ;;  %s458_s6 = int_to_ptr.hbm [resolvable:$true] %s457_s6 }
  0x51   : > { %1891 = dma.hbm_to_vmem [thread:$0]  (!%p2518_p6), %s458_s6, 64, %s460_s14, [#allocation12]  }
  0x52   : > { %s522_s11 = sshll.u32 %s514_s7, 4  ;;  %s520_s12 = sshll.u32 %s518_s16, 4  ;;  %s523_s11 = int_to_ptr.vmem [resolvable:$true] %s522_s11  ;;  %s521_s12 = int_to_ptr.hbm [resolvable:$true] %s520_s12 }
  0x53   : > { %s511_s6 = scalar_lea.sflag [#allocation3], %s2568_s4  ;;  %s2176_s14 = sshra.s32 %s521_s12, 4  ;;  %s2177_s14 = int_to_ptr.hbm [resolvable:$true] %s2176_s14 }
  0x54   : > { %s2178_s15 = scalar_lea.hbm %s2177_s14, 8  ;;  %p2184_p6 = scmp.lt.s32.totalorder %s2177_s14, %s2858_s0 }
  0x55   : > { %p2179_p1 = scmp.ne.s32.totalorder %s2177_s14, %s2178_s15  ;;  %p2185_p11 = scmp.lt.s32.totalorder %s2183_s28, %s2178_s15 }
  0x57   : > { %p2181_p7 = pnand %p2179_p1, %p2090_p9  ;;  %p2186_p12 = por %p2185_p11, %p2184_p6 }
  0x59   : > { %p2182_p10 = pneg %p2181_p7 }
  0x5b   : > { %p2187_p2 = pnand %p2186_p12, %p2182_p10 }
  0x5d   : > { %2190 = shalt.err (!%p2187_p2)
}
  0x5e   : > { %1901 = dma.hbm_to_vmem [thread:$0]  (!%p2580_p8), %s521_s12, 128, %s523_s11, %s511_s6  }
  0x5f   : > { %s556_s8 = scalar_lea.hbm %s2860_s2, %s2578_s23  ;;  %s552_s24 = scalar_lea.vmem [#allocation7], %s2575_s22 }
  0x60   : > { %s560_s16 = sshll.u32 %s552_s24, 4  ;;  %s558_s17 = sshll.u32 %s556_s8, 4  ;;  %s561_s16 = int_to_ptr.vmem [resolvable:$true] %s560_s16  ;;  %s559_s17 = int_to_ptr.hbm [resolvable:$true] %s558_s17 }
  0x61   : > { %s1797_s14 = sshll.u32 %s2568_s4, 1  ;;  %s2206_s15 = sshra.s32 %s559_s17, 4  ;;  %s2207_s15 = int_to_ptr.hbm [resolvable:$true] %s2206_s15 }
  0x62   : > { %s2208_s1 = scalar_lea.hbm %s2207_s15, 8  ;;  %s2213_s12 = scalar_lea.hbm %s2860_s2, 16 }
  0x63   : > { %p2209_p4 = scmp.ne.s32.totalorder %s2207_s15, %s2208_s1  ;;  %p2214_p10 = scmp.lt.s32.totalorder %s2207_s15, %s2860_s2 }
  0x64   : > { %p2215_p6 = scmp.lt.s32.totalorder %s2213_s12, %s2208_s1 }
  0x65   : > { %p2211_p1 = pnand %p2209_p4, %p2090_p9 }
  0x66   : > { %p2216_p11 = por %p2215_p6, %p2214_p10 }
  0x67   : > { %p2212_p7 = pneg %p2211_p1 }
  0x69   : > { %p2217_p12 = pnand %p2216_p11, %p2212_p7 }
  0x6b   : > { %2220 = shalt.err (!%p2217_p12)
}
  0x6c   : > { %1907 = dma.hbm_to_vmem [thread:$0]  (!%p2580_p8), %s559_s17, 128, %s561_s16, %s2592_s13  }
  0x6d   : > { %s1798_s4 = sshll.u32 %s2384_s21, 1  ;;  %s571_s7 = scalar_lea.vmem [#allocation8], %s1797_s14 }
  0x6e   : > { %s575_s18 = scalar_lea.hbm %s2861_s3, %s1798_s4  ;;  %s579_s29 = sshll.u32 %s571_s7, 4  ;;  %s580_s29 = int_to_ptr.vmem [resolvable:$true] %s579_s29 }
  0x6f   : > { %s577_s8 = sshll.u32 %s575_s18, 4  ;;  %s2916_s24 = sand.u32 1, %s2384_s21   ;;  %s578_s8 = int_to_ptr.hbm [resolvable:$true] %s577_s8 }
  0x70   : > { %s568_s15 = scalar_lea.sflag [#allocation9], %s2916_s24  ;;  %s2236_s1 = sshra.s32 %s578_s8, 4  ;;  %s2237_s1 = int_to_ptr.hbm [resolvable:$true] %s2236_s1 }
  0x71   : > { %s2238_s28 = scalar_lea.hbm %s2237_s1, 2  ;;  %s2243_s17 = scalar_lea.hbm %s2861_s3, 4 }
  0x72   : > { %p2239_p2 = scmp.ne.s32.totalorder %s2237_s1, %s2238_s28  ;;  %p2244_p7 = scmp.lt.s32.totalorder %s2237_s1, %s2861_s3 }
  0x73   : > { %p2245_p10 = scmp.lt.s32.totalorder %s2243_s17, %s2238_s28 }
  0x74   : > { %p2241_p4 = pnand %p2239_p2, %p2090_p9 }
  0x75   : > { %p2246_p6 = por %p2245_p10, %p2244_p7 }
  0x76   : > { %p2242_p1 = pneg %p2241_p4 }
  0x78   : > { %p2247_p11 = pnand %p2246_p6, %p2242_p1 }
  0x7a   : > { %2250 = shalt.err (!%p2247_p11)
}
  0x7b   : > { %1910 = dma.hbm_to_vmem [thread:$0]  (!%p2580_p8), %s578_s8, 32, %s580_s29, %s568_s15  }
  0x7c   : > { %588 = sbr.rel (%p2506_p3) target bundleno = 1247 (0x4df), region = 76  ;;  %s2676_s12 = sand.u32 (!%p2506_p3), 1, %s2376_s19  }
  0x7d   : > { %s2679_s6 = sshll.u32 (!%p2506_p3), %s2676_s12, 3  ;;  %s591_s23 = scalar_lea.sflag (!%p2506_p3), [#allocation3], %s2676_s12 }
  0x7e   : > { %s594_s4 = scalar_lea.vmem (!%p2506_p3), [#allocation2], %s2679_s6 }
  0x81   : > { %2339 = dma.done.wait (%p2558_p13), %s591_s23, 128  }
  0x82   : > { %2341 = vsyncadd (%p2558_p13), %s591_s23, 4294967168  ;;  %s600_s26 = sand.u32 1, %s2501_s25   ;;  %s604_s22 = scalar_lea.vmem [#allocation5], %s2679_s6 }
  0x83   : > { %s601_s30 = scalar_lea.sflag [#allocation6], %s600_s26 }
  0x84   : > { %2343 = dma.done.wait (%p2558_p13), %s601_s30, 256  }
  0x85   : > { %2345 = vsyncadd (%p2558_p13), %s601_s30, 4294967040  ;;  %s1803_s20 = sshll.u32 %s2676_s12, 1  ;;  %s614_s18 = scalar_lea.vmem [#allocation7], %s2679_s6 }
  0x86   : > { %s621_s7 = scalar_lea.sflag [#allocation9], %s600_s26  ;;  %s2695_s29 = scalar_lea.vmem [#allocation8], %s1803_s20 }
  0x87   : > { %2347 = dma.done.wait (%p2558_p13), %s621_s7, 32  }
  0x88   : > { %2349 = vsyncadd (%p2558_p13), %s621_s7, 4294967264  ;;  %p2917_p3 = scmp.eq.s32.totalorder %s2501_s25, 0 }
  0x8a   : > { %2351 = dma.done.wait (%p2917_p3), [#allocation9], 2048   ;;  %p2918_p8 = pmov %p2917_p3 }
  0x8b   : > { %p2919_p9 = pmov %p2917_p3 }
  0x8c   : > { %2353 = vsyncadd (%p2918_p8), [#allocation9], 4294965248 }
  0x8d   : > { %2355 = dma.done.wait (%p2919_p9), [#allocation12], 2112   ;;  %p2920_p12 = pmov %p2917_p3 }
  0x8e   : > { %p2921_p2 = pmov %p2917_p3 }
  0x8f   : > { %2357 = vsyncadd (%p2920_p12), [#allocation12], 4294965184 }
  0x90   : > { %2359 = dma.done.wait (%p2921_p2), [#allocation15], 4096   ;;  %p2922_p4 = pmov %p2921_p2 }
  0x91   : > { %v725_v0 = vld [vmem:[#allocation10 + $0x18] sm:$0xff]  ;;  %v724_v3 = vld [vmem:[#allocation10 + $0x10] sm:$0xff]  ;;  %v723_v6 = vld [vmem:[#allocation10 + $0x8] sm:$0xff]  ;;  %vm751_vm0 = vcmask 261120   ;;  %vm1172_vm3 = vcmask 64512   ;;  %s1810_s1 = sshll.u32 %s2676_s12, 5 }
  0x92   : > { %2361 = vsyncadd (%p2922_p4), [#allocation15], 4294963200  ;;  %v733_v1 = vld [vmem:[#allocation10 + $0x58] sm:$0xff]  ;;  %767 = vmatpush.msra.mxu0 %v725_v0  ;;  %v732_v4 = vld [vmem:[#allocation10 + $0x50] sm:$0xff]  ;;  %s2770_s28 = scalar_lea.vmem [#allocation18], %s1810_s1  ;;  %s2923_s17 = sld [smem:[#allocation39_spill]] }
  0x93   : > { %v737_v2 = vld [vmem:[#allocation10 + $0x78] sm:$0xff]  ;;  %807 = vmatpush.msra.mxu2 %v733_v1  ;;  %v736_v5 = vld [vmem:[#allocation10 + $0x70] sm:$0xff]  ;;  %v731_v7 = vld [vmem:[#allocation10 + $0x48] sm:$0xff]  ;;  %s1849_s14 = sshll.u32 %s2501_s25, 5  ;;  %s2925_s26 = sld [smem:[#allocation43_spill]] }
  0x94   : > { %827 = vmatpush.msra.mxu3 %v737_v2  ;;  %768 = vmatpush.msra.mxu0 %v724_v3  ;;  %v735_v8 = vld [vmem:[#allocation10 + $0x68] sm:$0xff]  ;;  %v722_v9 = vld [vmem:[#allocation10] sm:$0xff]  ;;  %v729_v11 = vld [vmem:[#allocation10 + $0x38] sm:$0xff] }
  0x95   : > { %808 = vmatpush.msra.mxu2 %v732_v4  ;;  %v730_v10 = vld [vmem:[#allocation10 + $0x40] sm:$0xff]  ;;  %v2715_v13 = vld [vmem:[%s594_s4] sm:$0xff]  ;;  %787 = vmatpush.msra.mxu1 %v729_v11 }
  0x96   : > { %828 = vmatpush.msra.mxu3 %v736_v5  ;;  %769 = vmatpush.msra.mxu0 %v723_v6  ;;  %v734_v12 = vld [vmem:[#allocation10 + $0x60] sm:$0xff]  ;;  %v838_v14 = vld [vmem:[#allocation11 + $0x18] sm:$0xff]  ;;  %v728_v17 = vld [vmem:[#allocation10 + $0x30] sm:$0xff] }
  0x97   : > { %809 = vmatpush.msra.mxu2 %v731_v7  ;;  %v846_v15 = vld [vmem:[#allocation11 + $0x58] sm:$0xff]  ;;  %v837_v18 = vld [vmem:[#allocation11 + $0x10] sm:$0xff]  ;;  %v727_v21 = vld [vmem:[#allocation10 + $0x28] sm:$0xff]  ;;  %788 = vmatpush.msra.mxu1 %v728_v17 }
  0x98   : > { %829 = vmatpush.msra.mxu3 %v735_v8  ;;  %770 = vmatpush.msra.mxu0 %v722_v9  ;;  %v850_v16 = vld [vmem:[#allocation11 + $0x78] sm:$0xff]  ;;  %v845_v19 = vld [vmem:[#allocation11 + $0x50] sm:$0xff]  ;;  %v836_v22 = vld [vmem:[#allocation11 + $0x8] sm:$0xff] }
  0x99   : > { %810 = vmatpush.msra.mxu2 %v730_v10  ;;  %1811 = vmatmul.msk.f32.vlgmr.msra.gmra.mxu0 %vm751_vm0, %v2715_v13  ;;  %v849_v20 = vld [vmem:[#allocation11 + $0x70] sm:$0xff]  ;;  %v844_v23 = vld [vmem:[#allocation11 + $0x48] sm:$0xff]  ;;  %v726_v25 = vld [vmem:[#allocation10 + $0x20] sm:$0xff]  ;;  %s1560_s30 = scalar_lea.hbm %s2925_s26, %s1849_s14  ;;  %s2286_s24 = scalar_lea.hbm %s2925_s26, 64 }
  0x9a   : > { %830 = vmatpush.msra.mxu3 %v734_v12  ;;  %1813 = vmatmul.msk.f32.vlgmr.msra.gmra.mxu2 %vm751_vm0, %v2715_v13  ;;  %v848_v24 = vld [vmem:[#allocation11 + $0x68] sm:$0xff]  ;;  %v835_v26 = vld [vmem:[#allocation11] sm:$0xff]  ;;  %v842_v30 = vld [vmem:[#allocation11 + $0x38] sm:$0xff]  ;;  %s1563_s20 = sshll.u32 %s1560_s30, 4  ;;  %s1564_s20 = int_to_ptr.hbm [resolvable:$true] %s1563_s20 }
  0x9b   : > { %1814 = vmatmul.msk.f32.vlgmr.msra.gmra.mxu3 %vm751_vm0, %v2715_v13  ;;  %879 = vmatpush.msrb.mxu0 %v838_v14  ;;  %v843_v27 = vld [vmem:[#allocation11 + $0x40] sm:$0xff]  ;;  %v841_v32 = vld [vmem:[#allocation11 + $0x30] sm:$0xff]  ;;  %v840_v33 = vld [vmem:[#allocation11 + $0x28] sm:$0xff]  ;;  %s2280_s7 = sshra.s32 %s1564_s20, 4  ;;  %s2281_s7 = int_to_ptr.hbm [resolvable:$true] %s2280_s7 }
  0x9c   : > { %919 = vmatpush.msrb.mxu2 %v846_v15  ;;  %939 = vmatpush.msrb.mxu3 %v850_v16  ;;  %v847_v28 = vld [vmem:[#allocation11 + $0x60] sm:$0xff]  ;;  %v949_v35 = vld [vmem:[#allocation14 + $0x10] sm:$0xff]  ;;  %v948_v36 = vld [vmem:[#allocation14 + $0x8] sm:$0xff]  ;;  %p2287_p10 = scmp.lt.s32.totalorder %s2281_s7, %s2925_s26 }
  0x9d   : > { %880 = vmatpush.msrb.mxu0 %v837_v18  ;;  %789 = vmatpush.msra.mxu1 %v727_v21  ;;  %v720_v29 = vld [vmem:[%s604_s22] sm:$0xff]  ;;  %v721_v40 = vld [vmem:[%s614_s18] sm:$0xff]  ;;  %s1561_s22 = sshll.u32 %s2770_s28, 4  ;;  %s1535_s18 = scalar_lea.sflag [#allocation19], %s2676_s12  ;;  %s1562_s22 = int_to_ptr.vmem [resolvable:$true] %s1561_s22 }
  0x9e   : > { %920 = vmatpush.msrb.mxu2 %v845_v19  ;;  %940 = vmatpush.msrb.mxu3 %v849_v20  ;;  %v950_v31 = vld [vmem:[#allocation14 + $0x18] sm:$0xff]  ;;  %v947_v39 = vld [vmem:[#allocation14] sm:$0xff]  ;;  %v957_v42 = vld [vmem:[#allocation14 + $0x50] sm:$0xff] }
  0x9f   : > { %881 = vmatpush.msrb.mxu0 %v836_v22  ;;  %790 = vmatpush.msra.mxu1 %v726_v25  ;;  %v839_v34 = vld [vmem:[#allocation11 + $0x20] sm:$0xff]  ;;  %v961_v43 = vld [vmem:[#allocation14 + $0x70] sm:$0xff]  ;;  %v956_v45 = vld [vmem:[#allocation14 + $0x48] sm:$0xff] }
  0xa0   : > { %921 = vmatpush.msrb.mxu2 %v844_v23  ;;  %941 = vmatpush.msrb.mxu3 %v848_v24  ;;  %v958_v37 = vld [vmem:[#allocation14 + $0x58] sm:$0xff]  ;;  %v953_v44 = vld [vmem:[#allocation14 + $0x30] sm:$0xff]  ;;  %v960_v46 = vld [vmem:[#allocation14 + $0x68] sm:$0xff] }
  0xa1   : > { %882 = vmatpush.msrb.mxu0 %v835_v26  ;;  %1812 = vmatmul.msk.f32.vlgmr.msra.gmra.mxu1 %vm751_vm0, %v2715_v13  ;;  %v962_v38 = vld [vmem:[#allocation14 + $0x78] sm:$0xff]  ;;  %v952_v47 = vld [vmem:[#allocation14 + $0x28] sm:$0xff]  ;;  %v955_v48 = vld [vmem:[#allocation14 + $0x40] sm:$0xff] }
  0xa2   : > { %922 = vmatpush.msrb.mxu2 %v843_v27  ;;  %942 = vmatpush.msrb.mxu3 %v847_v28  ;;  %v954_v41 = vld [vmem:[#allocation14 + $0x38] sm:$0xff]  ;;  %v959_v49 = vld [vmem:[#allocation14 + $0x60] sm:$0xff]  ;;  %v738_v53 = vld [vmem:[%s2863_s5] sm:$0xf] }
  0xa3   : > { %1815 = vmatmul.msk.f32.vlgmr.msrb.gmra.mxu0 %vm751_vm0, %v720_v29  ;;  %1817 = vmatmul.msk.f32.vlgmr.msrb.gmra.mxu2 %vm751_vm0, %v720_v29  ;;  %v951_v50 = vld [vmem:[#allocation14 + $0x20] sm:$0xff]  ;;  %v851_v52 = vld [vmem:[#allocation13] sm:$0xf]  ;;  %v743_v57 = vperm.slane %v738_v53, 0  ;;  %v741_v1 = vrot.slane %v738_v53, 2  ;;  %v740_v2 = vrot.slane %v738_v53, 1 }
  0xa4   : > { %1818 = vmatmul.msk.f32.vlgmr.msrb.gmra.mxu3 %vm751_vm0, %v720_v29  ;;  %899 = vmatpush.msrb.mxu1 %v842_v30  ;;  %v856_v56 = vperm.slane %v851_v52, 0  ;;  %v854_v59 = vrot.slane %v851_v52, 2  ;;  %v855_v61 = vrot.slane %v851_v52, 3  ;;  %v853_v63 = vrot.slane %v851_v52, 1  ;;  %v963_v20 = vld [vmem:[%s2867_s9] sm:$0xf] }
  0xa5   : > { %991 = vmatpush.msra.mxu0 %v950_v31  ;;  %1031 = vmatpush.msra.mxu2 %v958_v37  ;;  %v742_v3 = vrot.slane %v738_v53, 3  ;;  %v745_v7 = vperm.slane %v741_v1, 0  ;;  %v744_v8 = vperm.slane %v740_v2, 0  ;;  %v968_v21 = vperm.slane %v963_v20, 0 }
  0xa6   : > { %900 = vmatpush.msrb.mxu1 %v841_v32  ;;  %1051 = vmatpush.msra.mxu3 %v962_v38  ;;  %v858_v4 = vperm.slane %v854_v59, 0  ;;  %v859_v5 = vperm.slane %v855_v61, 0  ;;  %v857_v6 = vperm.slane %v853_v63, 0  ;;  %v965_v24 = vrot.slane %v963_v20, 1 }
  0xa7   : > { %992 = vmatpush.msra.mxu0 %v949_v35  ;;  %1032 = vmatpush.msra.mxu2 %v957_v42  ;;  %v746_v10 = vperm.slane %v742_v3, 0  ;;  %v966_v28 = vrot.slane %v963_v20, 2  ;;  %v2393_v37 = vmov 0  }
  0xa8   : > { %901 = vmatpush.msrb.mxu1 %v840_v33  ;;  %1052 = vmatpush.msra.mxu3 %v961_v43  ;;  %v969_v25 = vperm.slane %v965_v24, 0 }
  0xa9   : > { %993 = vmatpush.msra.mxu0 %v948_v36  ;;  %1033 = vmatpush.msra.mxu2 %v956_v45  ;;  %v970_v30 = vperm.slane %v966_v28, 0  ;;  %v1163_v36 = vld [vmem:[%s2695_s29] sm:$0x3]  ;;  %s2282_s29 = scalar_lea.hbm %s2281_s7, 32 }
  0xaa   : > { %902 = vmatpush.msrb.mxu1 %v839_v34  ;;  %1053 = vmatpush.msra.mxu3 %v960_v46  ;;  %vm1164_vm1 = vnez %v1163_v36  ;;  %p2283_p13 = scmp.ne.s32.totalorder %s2281_s7, %s2282_s29  ;;  %p2288_p6 = scmp.lt.s32.totalorder %s2286_s24, %s2282_s29 }
  0xab   : > { %1816 = vmatmul.msk.f32.vlgmr.msrb.gmra.mxu1 %vm751_vm0, %v720_v29  ;;  %994 = vmatpush.msra.mxu0 %v947_v39  ;;  %v967_v29 = vrot.slane %v963_v20, 3  ;;  %v1165_v38 = vsel %vm1164_vm1, 16843009, %v2393_v37 }
  0xac   : > { %1819 = vmatmul.msk.f32.vlgmr.msra.gmra.mxu0 %vm751_vm0, %v721_v40  ;;  %1011 = vmatpush.msra.mxu1 %v954_v41  ;;  %v1166_v39 = vunpack.c.0.s8 %v1165_v38  ;;  %p2284_p1 = pnand %p2283_p13, %p2562_p0  ;;  %p2289_p11 = por %p2288_p6, %p2287_p10 }
  0xad   : > { %1034 = vmatpush.msra.mxu2 %v955_v48  ;;  %1054 = vmatpush.msra.mxu3 %v959_v49  ;;  %v971_v32 = vperm.slane %v967_v29, 0 }
  0xae   : > { %1012 = vmatpush.msra.mxu1 %v953_v44  ;;  %1821 = vmatmul.msk.f32.vlgmr.msra.gmra.mxu2 %vm751_vm0, %v721_v40  ;;  %vm1167_vm2 = vcmp.ne.s32.totalorder %v1166_v39, 0  ;;  %p2285_p7 = pneg %p2284_p1 }
  0xaf   : > { %1822 = vmatmul.msk.f32.vlgmr.msra.gmra.mxu3 %vm751_vm0, %v721_v40 }
  0xb0   : > { %1013 = vmatpush.msra.mxu1 %v952_v47  ;;  %p2290_p3 = pnand %p2289_p11, %p2285_p7 }
  0xb2   : > { %1014 = vmatpush.msra.mxu1 %v951_v50 }
  0xb3   : > { %1820 = vmatmul.msk.f32.vlgmr.msra.gmra.mxu1 %vm751_vm0, %v721_v40 }
 0x116   : > { %v772_v51 = vpop.f32.mrf.mxu0 }
 0x117   : > { %v773_v0 = vadd.f32 %v772_v51, %v743_v57 }
 0x11d   : > { %v812_v54 = vpop.f32.mrf.mxu2 }
 0x11e   : > { %v832_v55 = vpop.f32.mrf.mxu3  ;;  %v792_v58 = vpop.f32.mrf.mxu1  ;;  %v813_v17 = vadd.f32 %v812_v54, %v745_v7 }
 0x11f   : > { %v793_v18 = vadd.f32 %v792_v58, %v744_v8  ;;  %v833_v19 = vadd.f32 %v832_v55, %v746_v10 }
 0x120   : > { %v884_v60 = vpop.f32.mrf.mxu0 }
 0x121   : > { %v885_v62 = vadd.f32 %v884_v60, %v856_v56 }
 0x123   : > { %1823 = vmatpush.xpose.msk.msrb.mxu0 %vm751_vm0, %v885_v62 }
 0x126   : > { %v924_v9 = vpop.f32.mrf.mxu2  ;;  %1824 = vmatmul.msk.f32.vlgmr.msrb.gmra.mxu0 %vm751_vm0, %v773_v0 }
 0x127   : > { %v925_v11 = vadd.f32 %v924_v9, %v858_v4  ;;  %v944_v12 = vpop.f32.mrf.mxu3 }
 0x128   : > { %v945_v14 = vadd.f32 %v944_v12, %v859_v5  ;;  %v904_v15 = vpop.f32.mrf.mxu1  ;;  %v1371_v12 = vld [vmem:[#allocation16 + $0x18] sm:$0xff] }
 0x129   : > { %v905_v16 = vadd.f32 %v904_v15, %v857_v6  ;;  %1827 = vmatpush.xpose.msk.msrb.mxu2 %vm751_vm0, %v925_v11  ;;  %v996_v22 = vpop.f32.mrf.mxu0 }
 0x12a   : > { %1829 = vmatpush.xpose.msk.msrb.mxu3 %vm751_vm0, %v945_v14  ;;  %v997_v23 = vadd.f32 %v996_v22, %v968_v21  ;;  %v1370_v14 = vld [vmem:[#allocation16 + $0x10] sm:$0xff] }
 0x12b   : > { %1825 = vmatpush.xpose.msk.msrb.mxu1 %vm751_vm0, %v905_v16  ;;  %v1369_v16 = vld [vmem:[#allocation16 + $0x8] sm:$0xff] }
 0x12c   : > { %1828 = vmatmul.msk.f32.vlgmr.msrb.gmra.mxu2 %vm751_vm0, %v813_v17  ;;  %1294 = vmatpush.msra.mxu0 %v997_v23 }
 0x12d   : > { %1830 = vmatmul.msk.f32.vlgmr.msrb.gmra.mxu3 %vm751_vm0, %v833_v19 }
 0x12e   : > { %1826 = vmatmul.msk.f32.vlgmr.msrb.gmra.mxu1 %vm751_vm0, %v793_v18  ;;  %1399 = vmatpush.msrb.mxu0 %v1371_v12 }
 0x130   : > { %v1016_v26 = vpop.f32.mrf.mxu1  ;;  %1400 = vmatpush.msrb.mxu0 %v1370_v14 }
 0x131   : > { %v1017_v27 = vadd.f32 %v1016_v26, %v969_v25  ;;  %v1036_v31 = vpop.f32.mrf.mxu2 }
 0x132   : > { %v1037_v33 = vadd.f32 %v1036_v31, %v970_v30  ;;  %v1056_v34 = vpop.f32.mrf.mxu3  ;;  %1401 = vmatpush.msrb.mxu0 %v1369_v16 }
 0x133   : > { %1317 = vmatpush.msra.mxu1 %v1017_v27  ;;  %v1057_v35 = vadd.f32 %v1056_v34, %v971_v32 }
 0x134   : > { %1340 = vmatpush.msra.mxu2 %v1037_v33 }
 0x135   : > { %1363 = vmatpush.msra.mxu3 %v1057_v35 }
 0x1a3   : > { %v1082_v40 = vpop.f32.mrf.mxu0 }
 0x1a4   : > { %v1168_v41 = vsel %vm1167_vm2, -1e+09, %v1082_v40 }
 0x1a5   : > { %v1173_v42 = vsel %vm1172_vm3, %v1168_v41, -inf }
 0x1a6   : > { %1174 = vmax.xlane.f32.xlu1 %v1173_v42 }
 0x1ab   : > { %v1108_v43 = vpop.f32.mrf.mxu1 }
 0x1ac   : > { %v1169_v44 = vsel %vm1167_vm2, -1e+09, %v1108_v43 }
 0x1ad   : > { %v1176_v45 = vsel %vm1172_vm3, %v1169_v44, -inf }
 0x1ae   : > { %1177 = vmax.xlane.f32.xlu1 %v1176_v45 }
 0x1af   : > { %v1134_v46 = vpop.f32.mrf.mxu2 }
 0x1b0   : > { %v1170_v47 = vsel %vm1167_vm2, -1e+09, %v1134_v46  ;;  %v1160_v49 = vpop.f32.mrf.mxu3 }
 0x1b1   : > { %v1179_v48 = vsel %vm1172_vm3, %v1170_v47, -inf  ;;  %v1171_v50 = vsel %vm1167_vm2, -1e+09, %v1160_v49 }
 0x1b2   : > { %1180 = vmax.xlane.f32.xlu0 %v1179_v48  ;;  %v1182_v51 = vsel %vm1172_vm3, %v1171_v50, -inf }
 0x1ba   : > { %1183 = vmax.xlane.f32.xlu0 %v1182_v51 }
 0x219   : > { %v1175_v52 = vpop.xlane.xlu1 %1174 }
 0x21a   : > { %v1185_v53 = vsub.f32 %v1168_v41, %v1175_v52 }
 0x21c   : > { %v1189_v54 = vmul.f32 1.442695, %v1185_v53 }
 0x21e   : > { %1976 = vpow2.f32 %v1189_v54 }
 0x221   : > { %v1178_v55 = vpop.xlane.xlu1 %1177 }
 0x222   : > { %v1186_v56 = vsub.f32 %v1169_v44, %v1178_v55 }
 0x224   : > { %v1977_v57 = vpop.eup %1976  ;;  %v1191_v58 = vmul.f32 1.442695, %v1186_v56 }
 0x225   : > { %v1181_v59 = vpop.xlane.xlu0 %1180  ;;  %v1197_v60 = vsel %vm1172_vm3, %v1977_v57, 0.0 }
 0x226   : > { %1978 = vpow2.f32 %v1191_v58  ;;  %v1187_v61 = vsub.f32 %v1170_v47, %v1181_v59  ;;  %1198 = vadd.xlane.f32.xlu0 %v1197_v60  ;;  %v1368_v60 = vld [vmem:[#allocation16] sm:$0xff] }
 0x227   : > { %1402 = vmatpush.msrb.mxu0 %v1368_v60 }
 0x228   : > { %v1193_v62 = vmul.f32 1.442695, %v1187_v61  ;;  %v1375_v61 = vld [vmem:[#allocation16 + $0x38] sm:$0xff] }
 0x229   : > { %1422 = vmatpush.msrb.mxu1 %v1375_v61 }
 0x22a   : > { %1980 = vpow2.f32 %v1193_v62  ;;  %v1374_v62 = vld [vmem:[#allocation16 + $0x30] sm:$0xff] }
 0x22b   : > { %1423 = vmatpush.msrb.mxu1 %v1374_v62 }
 0x22c   : > { %v2757_v63 = vpop.eup %1978 }
 0x22d   : > { %v1184_v0 = vpop.xlane.xlu0 %1183  ;;  %v1200_v1 = vsel %vm1172_vm3, %v2757_v63, 0.0 }
 0x22e   : > { %v1188_v2 = vsub.f32 %v1171_v50, %v1184_v0  ;;  %1201 = vadd.xlane.f32.xlu1 %v1200_v1  ;;  %v1372_v0 = vld [vmem:[#allocation16 + $0x20] sm:$0xff]  ;;  %v1379_v1 = vld [vmem:[#allocation16 + $0x58] sm:$0xff] }
 0x22f   : > { %1445 = vmatpush.msrb.mxu2 %v1379_v1 }
 0x230   : > { %v2761_v3 = vpop.eup %1980  ;;  %v1195_v4 = vmul.f32 1.442695, %v1188_v2  ;;  %v1378_v2 = vld [vmem:[#allocation16 + $0x50] sm:$0xff] }
 0x231   : > { %v1203_v5 = vsel %vm1172_vm3, %v2761_v3, 0.0  ;;  %1446 = vmatpush.msrb.mxu2 %v1378_v2 }
 0x232   : > { %1982 = vpow2.f32 %v1195_v4  ;;  %1204 = vadd.xlane.f32.xlu2 %v1203_v5  ;;  %v1376_v4 = vld [vmem:[#allocation16 + $0x40] sm:$0xff]  ;;  %v1383_v5 = vld [vmem:[#allocation16 + $0x78] sm:$0xff] }
 0x233   : > { %1468 = vmatpush.msrb.mxu3 %v1383_v5 }
 0x238   : > { %v2765_v6 = vpop.eup %1982 }
 0x239   : > { %v1206_v7 = vsel %vm1172_vm3, %v2765_v6, 0.0 }
 0x23a   : > { %1207 = vadd.xlane.f32.xlu2 %v1206_v7  ;;  %v1381_v7 = vld [vmem:[#allocation16 + $0x68] sm:$0xff] }
 0x299   : > { %v1199_v8 = vpop.xlane.xlu0 %1198 }
 0x29a   : > { %1984 = vrcp.f32 %v1199_v8  ;;  %v1220_v17 = vand.u32 2147483648, %v1199_v8  ;;  %v1218_v19 = vand.u32 2147483647, %v1199_v8  ;;  %vm1214_vm5 = vweird.f32 %v1199_v8 }
 0x29c   : > { %v1221_v23 = vor.u32 1.1754944e-38, %v1220_v17  ;;  %vm1219_vm7 = vcmp.eq.f32.partialorder %v1218_v19, 8.507059e+37 }
 0x2a0   : > { %v1985_v9 = vpop.eup %1984 }
 0x2a1   : > { %v1210_v10 = vmul.f32 %v1985_v9, %v1199_v8  ;;  %v1202_v11 = vpop.xlane.xlu1 %1201  ;;  %vm1215_vm4 = vweird.f32 %v1985_v9  ;;  %v1380_v8 = vld [vmem:[#allocation16 + $0x60] sm:$0xff] }
 0x2a2   : > { %1986 = vrcp.f32 %v1202_v11  ;;  %vm1216_vm6 = vmor %vm1214_vm5, %vm1215_vm4  ;;  %v1233_v30 = vand.u32 2147483647, %v1202_v11  ;;  %v1235_v31 = vand.u32 2147483648, %v1202_v11  ;;  %vm1229_vm9 = vweird.f32 %v1202_v11 }
 0x2a3   : > { %v1211_v15 = vsub.f32 1.0, %v1210_v10 }
 0x2a4   : > { %vm1234_vm11 = vcmp.eq.f32.partialorder %v1233_v30, 8.507059e+37  ;;  %v1236_v37 = vor.u32 1.1754944e-38, %v1235_v31 }
 0x2a5   : > { %v1212_v18 = vmul.f32 %v1985_v9, %v1211_v15  ;;  %v1205_v20 = vpop.xlane.xlu2 %1204 }
 0x2a6   : > { %1988 = vrcp.f32 %v1205_v20  ;;  %v1250_v38 = vand.u32 2147483648, %v1205_v20  ;;  %v1248_v41 = vand.u32 2147483647, %v1205_v20  ;;  %vm1244_vm13 = vweird.f32 %v1205_v20 }
 0x2a7   : > { %v1213_v21 = vadd.f32 %v1985_v9, %v1212_v18 }
 0x2a8   : > { %v1987_v22 = vpop.eup %1986  ;;  %v1251_v46 = vor.u32 1.1754944e-38, %v1250_v38  ;;  %vm1249_vm15 = vcmp.eq.f32.partialorder %v1248_v41, 8.507059e+37 }
 0x2a9   : > { %v1217_v24 = vsel %vm1216_vm6, %v1985_v9, %v1213_v21  ;;  %v1225_v25 = vmul.f32 %v1987_v22, %v1202_v11  ;;  %vm1230_vm8 = vweird.f32 %v1987_v22 }
 0x2aa   : > { %v1222_v26 = vsel %vm1219_vm7, %v1221_v23, %v1217_v24  ;;  %vm1231_vm10 = vmor %vm1229_vm9, %vm1230_vm8  ;;  %v1973_v23 = vld [vmem:[%s2923_s17] ss:$0 sm:$0xff] }
 0x2ab   : > { %v1226_v27 = vsub.f32 1.0, %v1225_v25  ;;  %v1223_v28 = vmul.f32 %v1977_v57, %v1222_v26 }
 0x2ac   : > { %v1989_v29 = vpop.eup %1988 }
 0x2ad   : > { %v1227_v32 = vmul.f32 %v1987_v22, %v1226_v27  ;;  %v1240_v33 = vmul.f32 %v1989_v29, %v1205_v20  ;;  %v1208_v34 = vpop.xlane.xlu2 %1207  ;;  %1269 = vst.msk [vmem:[%s2770_s28] sm:$0xff] %vm1172_vm3, %v1223_v28  ;;  %1834 = vmatmul.msk.f32.vlgmr.msra.gmra.mxu0 %vm1172_vm3, %v1223_v28  ;;  %vm1245_vm12 = vweird.f32 %v1989_v29 }
 0x2ae   : > { %1990 = vrcp.f32 %v1208_v34  ;;  %vm1246_vm14 = vmor %vm1244_vm13, %vm1245_vm12  ;;  %v1265_v52 = vand.u32 2147483648, %v1208_v34  ;;  %v1263_v54 = vand.u32 2147483647, %v1208_v34  ;;  %vm1259_vm2 = vweird.f32 %v1208_v34 }
 0x2af   : > { %v1228_v35 = vadd.f32 %v1987_v22, %v1227_v32  ;;  %v1241_v36 = vsub.f32 1.0, %v1240_v33 }
 0x2b0   : > { %v1266_v56 = vor.u32 1.1754944e-38, %v1265_v52  ;;  %vm1264_vm5 = vcmp.eq.f32.partialorder %v1263_v54, 8.507059e+37 }
 0x2b1   : > { %v1232_v39 = vsel %vm1231_vm10, %v1987_v22, %v1228_v35  ;;  %v1242_v40 = vmul.f32 %v1989_v29, %v1241_v36 }
 0x2b2   : > { %v1237_v42 = vsel %vm1234_vm11, %v1236_v37, %v1232_v39 }
 0x2b3   : > { %v1238_v43 = vmul.f32 %v2757_v63, %v1237_v42  ;;  %v1243_v44 = vadd.f32 %v1989_v29, %v1242_v40  ;;  %v1373_v63 = vld [vmem:[#allocation16 + $0x28] sm:$0xff] }
 0x2b4   : > { %v1991_v45 = vpop.eup %1990  ;;  %1424 = vmatpush.msrb.mxu1 %v1373_v63 }
 0x2b5   : > { %1831 = vst.msk [vmem:[%s2770_s28 + $0x8] sm:$0xff] %vm1172_vm3, %v1238_v43  ;;  %v1247_v47 = vsel %vm1246_vm14, %v1989_v29, %v1243_v44  ;;  %v1255_v48 = vmul.f32 %v1991_v45, %v1208_v34  ;;  %1835 = vmatmul.msk.f32.vlgmr.msra.gmra.mxu1 %vm1172_vm3, %v1238_v43  ;;  %vm1260_vm1 = vweird.f32 %v1991_v45  ;;  %v2394_v29 = vmov 32.0  }
 0x2b6   : > { %v1252_v49 = vsel %vm1249_vm15, %v1251_v46, %v1247_v47  ;;  %vm1261_vm4 = vmor %vm1259_vm2, %vm1260_vm1  ;;  %1425 = vmatpush.msrb.mxu1 %v1372_v0  ;;  %1992 = vrcp.f32 %v2394_v29 }
 0x2b7   : > { %v1256_v50 = vsub.f32 1.0, %v1255_v48  ;;  %v1253_v51 = vmul.f32 %v2761_v3, %v1252_v49  ;;  %v1377_v3 = vld [vmem:[#allocation16 + $0x48] sm:$0xff] }
 0x2b8   : > { %1447 = vmatpush.msrb.mxu2 %v1377_v3 }
 0x2b9   : > { %v1257_v53 = vmul.f32 %v1991_v45, %v1256_v50  ;;  %1832 = vst.msk [vmem:[%s2770_s28 + $0x10] sm:$0xff] %vm1172_vm3, %v1253_v51  ;;  %1836 = vmatmul.msk.f32.vlgmr.msra.gmra.mxu2 %vm1172_vm3, %v1253_v51 }
 0x2ba   : > { %1448 = vmatpush.msrb.mxu2 %v1376_v4 }
 0x2bb   : > { %v1258_v55 = vadd.f32 %v1991_v45, %v1257_v53 }
 0x2bc   : > { %v1993_v30 = vpop.eup %1992 }
 0x2bd   : > { %v1262_v57 = vsel %vm1261_vm4, %v1991_v45, %v1258_v55  ;;  %v1493_v31 = vmul.f32 32.0, %v1993_v30 }
 0x2be   : > { %v1267_v58 = vsel %vm1264_vm5, %v1266_v56, %v1262_v57 }
 0x2bf   : > { %v1268_v59 = vmul.f32 %v2765_v6, %v1267_v58  ;;  %v1382_v6 = vld [vmem:[#allocation16 + $0x70] sm:$0xff]  ;;  %v1494_v32 = vsub.f32 1.0, %v1493_v31 }
 0x2c0   : > { %1469 = vmatpush.msrb.mxu3 %v1382_v6 }
 0x2c1   : > { %1833 = vst.msk [vmem:[%s2770_s28 + $0x18] sm:$0xff] %vm1172_vm3, %v1268_v59  ;;  %1837 = vmatmul.msk.f32.vlgmr.msra.gmra.mxu3 %vm1172_vm3, %v1268_v59  ;;  %v1495_v33 = vmul.f32 %v1993_v30, %v1494_v32  ;;  %vm1497_vm3 = vweird.f32 %v1993_v30 }
 0x2c2   : > { %1470 = vmatpush.msrb.mxu3 %v1381_v7 }
 0x2c3   : > { %v1496_v34 = vadd.f32 %v1993_v30, %v1495_v33 }
 0x2c4   : > { %1471 = vmatpush.msrb.mxu3 %v1380_v8 }
 0x2c5   : > { %v1498_v35 = vsel %vm1497_vm3, %v1993_v30, %v1496_v34 }
 0x32a   : > { %v1296_v9 = vpop.f32.mrf.mxu0 }
 0x32b   : > { %1838 = vmatmul.msk.f32.vlgmr.msrb.gmra.mxu0 %vm751_vm0, %v1296_v9 }
 0x332   : > { %v1319_v10 = vpop.f32.mrf.mxu1 }
 0x333   : > { %1839 = vmatmul.msk.f32.vlgmr.msrb.gmra.mxu1 %vm751_vm0, %v1319_v10 }
 0x33c   : > { %v1342_v11 = vpop.f32.mrf.mxu2 }
 0x33d   : > { %1840 = vmatmul.msk.f32.vlgmr.msrb.gmra.mxu2 %vm751_vm0, %v1342_v11 }
 0x344   : > { %v1365_v12 = vpop.f32.mrf.mxu3 }
 0x345   : > { %1841 = vmatmul.msk.f32.vlgmr.msrb.gmra.mxu3 %vm751_vm0, %v1365_v12 }
 0x3a8   : > { %v1404_v15 = vpop.f32.mrf.mxu0 }
 0x3a9   : > { %v1476_v18 = vsel %vm751_vm0, %v1404_v15, 0.0 }
 0x3b0   : > { %v1427_v14 = vpop.f32.mrf.mxu1 }
 0x3b1   : > { %v1477_v17 = vsel %vm751_vm0, %v1427_v14, 0.0 }
 0x3b2   : > { %v1478_v20 = vadd.f32 %v1477_v17, %v1476_v18 }
 0x3c0   : > { %v1450_v16 = vpop.f32.mrf.mxu2 }
 0x3c1   : > { %v1479_v19 = vsel %vm751_vm0, %v1450_v16, 0.0 }
 0x3c2   : > { %v1480_v21 = vadd.f32 %v1479_v19, %v1478_v20 }
 0x3c8   : > { %v1473_v22 = vpop.f32.mrf.mxu3 }
 0x3c9   : > { %v1481_v24 = vsel %vm751_vm0, %v1473_v22, 0.0 }
 0x3ca   : > { %v1482_v25 = vadd.f32 %v1481_v24, %v1480_v21 }
 0x3cc   : > { %v1487_v26 = vadd.f32 %v1973_v23, %v1482_v25 }
 0x3ce   : > { %v1488_v27 = vadd.f32 %v1487_v26, %v2715_v13 }
 0x3d0   : > { %v1489_v28 = vsel %vm751_vm0, %v1488_v27, 0.0 }
 0x3d1   : > { %1490 = vadd.xlane.f32.xlu2 %v1489_v28 }
 0x444   : > { %v1491_v36 = vpop.xlane.xlu2 %1490 }
 0x445   : > { %v1499_v37 = vmul.f32 %v1498_v35, %v1491_v36 }
 0x447   : > { %v1500_v38 = vsub.f32 %v1488_v27, %v1499_v37 }
 0x449   : > { %v1501_v13 = vmul.f32 %v1500_v38, %v1500_v38 }
 0x44b   : > { %v1502_v39 = vsel %vm751_vm0, %v1501_v13, 0.0 }
 0x44c   : > { %1503 = vadd.xlane.f32.xlu0 %v1502_v39 }
 0x44d   : > { %2293 = shalt.err (!%p2290_p3)
}
 0x44e   : > { %s2395_s28 = smov 128   ;;  %s2396_s13 = smov 8  }
 0x44f   : > { %1879 = dma.vmem_to_hbm [thread:$0]  (%p2562_p0), %s1562_s22, 512, %s1564_s20, %s1535_s18, %s2395_s28, %s2395_s28, %s2396_s13  }
 0x450   : > { %s1844_s16 = sshll.u32 %s2501_s25, 3  ;;  %s2926_s23 = sld [smem:[#allocation40_spill]] }
 0x451   : > { %s2927_s22 = sld [smem:[#allocation42_spill]]  ;;  %s709_s25 = scalar_lea.vmem [#allocation17], %s2679_s6 }
 0x452   : > { %s2928_s29 = sld [smem:[#allocation41_spill]]  ;;  %s1547_s27 = sshll.u32 %s709_s25, 4  ;;  %s1548_s27 = int_to_ptr.vmem [resolvable:$true] %s1547_s27 }
 0x453   : > { %s1530_s24 = scalar_lea.sflag [#allocation4], %s2676_s12 }
 0x456   : > { %v1974_v49 = vld [vmem:[%s2926_s23] ss:$0 sm:$0xff] }
 0x457   : > { %s1545_s20 = scalar_lea.hbm %s2927_s22, %s1844_s16  ;;  %s2314_s6 = scalar_lea.hbm %s2927_s22, 16 }
 0x458   : > { %v1975_v52 = vld [vmem:[%s2928_s29] ss:$0 sm:$0xff]  ;;  %s1549_s8 = sshll.u32 %s1545_s20, 4  ;;  %s1550_s8 = int_to_ptr.hbm [resolvable:$true] %s1549_s8 }
 0x459   : > { %s2308_s15 = sshra.s32 %s1550_s8, 4  ;;  %s2309_s15 = int_to_ptr.hbm [resolvable:$true] %s2308_s15 }
 0x45a   : > { %s2310_s1 = scalar_lea.hbm %s2309_s15, 8  ;;  %p2315_p2 = scmp.lt.s32.totalorder %s2309_s15, %s2927_s22 }
 0x45b   : > { %p2311_p8 = scmp.ne.s32.totalorder %s2309_s15, %s2310_s1  ;;  %p2316_p4 = scmp.lt.s32.totalorder %s2314_s6, %s2310_s1 }
 0x45d   : > { %p2312_p9 = pnand %p2311_p8, %p2562_p0  ;;  %p2317_p13 = por %p2316_p4, %p2315_p2 }
 0x45f   : > { %p2313_p12 = pneg %p2312_p9 }
 0x461   : > { %p2318_p1 = pnand %p2317_p13, %p2313_p12 }
 0x4bf   : > { %v1504_v40 = vpop.xlane.xlu0 %1503 }
 0x4c0   : > { %v1505_v41 = vmul.f32 %v1504_v40, %v1498_v35 }
 0x4c2   : > { %v1506_v42 = vadd.f32 1e-05, %v1505_v41 }
 0x4c4   : > { %1994 = vrsqrt.f32 %v1506_v42  ;;  %vm1513_vm7 = vweird.f32 %v1506_v42 }
 0x4ca   : > { %v1995_v43 = vpop.eup %1994 }
 0x4cb   : > { %v1508_v44 = vmul.f32 %v1995_v43, %v1506_v42  ;;  %vm1514_vm6 = vweird.f32 %v1995_v43 }
 0x4cc   : > { %vm1515_vm8 = vmor %vm1513_vm7, %vm1514_vm6 }
 0x4cd   : > { %v1509_v45 = vmul.f32 %v1995_v43, %v1508_v44 }
 0x4cf   : > { %v1510_v46 = vmul.f32 0.5, %v1509_v45 }
 0x4d1   : > { %v1511_v47 = vsub.f32 1.5, %v1510_v46 }
 0x4d3   : > { %v1512_v48 = vmul.f32 %v1995_v43, %v1511_v47 }
 0x4d5   : > { %v1516_v50 = vsel %vm1515_vm8, %v1995_v43, %v1512_v48 }
 0x4d6   : > { %v1517_v51 = vmul.f32 %v1516_v50, %v1500_v38 }
 0x4d8   : > { %v1522_v53 = vmul.f32 %v1974_v49, %v1517_v51 }
 0x4da   : > { %v1527_v54 = vadd.f32 %v1975_v52, %v1522_v53 }
 0x4dc   : > { %1528 = vst.msk [vmem:[%s709_s25] sm:$0xff] %vm751_vm0, %v1527_v54 }
 0x4dd   : > { %2321 = shalt.err (!%p2318_p1)
}
 0x4de   : > { %1878 = dma.vmem_to_hbm [thread:$0]  (%p2562_p0), %s1548_s27, 128, %s1550_s8, %s1530_s24  }
 0x4df PF: > { %s2929_s12 = sld [smem:[#allocation28_spill]]  ;;  %p2931_p7 = scmp.ge.s32.totalorder %s2384_s21, 2 }
 0x4e1   : > { %p1912_p10 = pnand %p2931_p7, %p2570_p5 }
 0x4e3   : > { %p1913_p6 = pneg %p1912_p10 }
 0x4e5   : > { %s1578_s23 = sand.u32 1, %s2929_s12  }
 0x4e6   : > { %s1579_s4 = scalar_lea.sflag [#allocation4], %s1578_s23 }
 0x4e7   : > { %2363 = dma.done.wait (%p1913_p6), %s1579_s4, 128  }
 0x4e8   : > { %2365 = vsyncadd (%p1913_p6), %s1579_s4, 4294967168  ;;  %s1589_s30 = scalar_lea.sflag [#allocation19], %s1578_s23 }
 0x4e9   : > { %2367 = dma.done.wait (%p1913_p6), %s1589_s30, 512  }
 0x4ea   : > { %2369 = vsyncadd (%p1913_p6), %s1589_s30, 4294966784  ;;  %s2932_s21 = sld [smem:[#allocation30_spill]]  ;;  %s2935_s18 = smov %s2376_s19 }
 0x4eb   : > { %s2933_s20 = sld [smem:[#allocation29_spill]] }
 0x4ec   : > { %s2934_s11 = sld [smem:[#allocation31_spill]] }
 0x4f0   : > { %p40_p0 = scmp.ge.s32.totalorder %s2932_s21, 4  }
 0x4f1   : > { %s2936_s19 = smov %s2933_s20 }
 0x4f2   : > { %s2937_s20 = smov %s2934_s11  ;;  %42 = sbr.rel (!%p40_p0) target bundleno = 24 (0x18), region = 198 }
 0x4f7   :  { %1595 = vsyncpa [#allocation3], 1 }
 0x4f8   :  { %1597 = vsyncpa [#allocation3 + $0x1], 1 }
 0x4f9   :  { %1598 = vsyncpa [#allocation6], 1 }
 0x4fa   :  { %1600 = vsyncpa [#allocation6 + $0x1], 1 }
 0x4fb   :  { %1601 = vsyncpa [#allocation9], 1 }
 0x4fc   :  { %1603 = vsyncpa [#allocation9 + $0x1], 1 }
 0x4fd   :  { %1604 = vsyncpa [#allocation12], 1 }
 0x4fe   :  { %1605 = vsyncpa [#allocation15], 1 }
 0x4ff   :  { %1606 = vsyncpa [#allocation4], 1 }
 0x500   :  { %1608 = vsyncpa [#allocation4 + $0x1], 1 }
 0x501   :  { %1609 = vsyncpa [#allocation19], 1 }
 0x502   :  { %1611 = vsyncpa [#allocation19 + $0x1], 1 }

</bundles_post_ra>
